<compile_context>
chip_gen: v5e
topology: v5e:2x2
jax: 0.10.0
libtpu: 0.0.40
codegen_flags: <defaults>
</compile_context>

<pallas_src>
import functools
import math

import jax
import jax.numpy as jnp
from jax.experimental import pallas as pl
from jax.experimental.pallas import tpu as pltpu


def srss(x):
    # activation: 1 - 2 / (x^2 + 1)
    return 1.0 - 2.0 / (x * x + 1.0)


def _rup(x, m):
    return ((x + m - 1) // m) * m


def qgcn_kernel(a_ref, x0_ref, slab_ref, out_ref, *,
                F, D, C_pad, B, BN,
                r_w1, r_w2, r_w3, r_wl, r_wr, r_b, r_S):
    A = a_ref[...]                                   # (BN, BN) block-diag adjacency
    x0 = x0_ref[...]                                 # (BN, F)

    # Static, sublane-aligned views into the packed parameter slab.
    w1 = slab_ref[r_w1:r_w1 + F, 0:D]
    w2 = slab_ref[r_w2:r_w2 + D, 0:D]
    w3 = slab_ref[r_w3:r_w3 + D, 0:D]
    wl = slab_ref[r_wl:r_wl + D, 0:1]
    wr = slab_ref[r_wr:r_wr + F, 0:C_pad]
    b1 = slab_ref[r_b + 0:r_b + 1, 0:D]
    b2 = slab_ref[r_b + 1:r_b + 2, 0:D]
    b3 = slab_ref[r_b + 2:r_b + 3, 0:D]
    br = slab_ref[r_b + 3:r_b + 4, 0:C_pad]
    bl = slab_ref[r_b + 4:r_b + 5, 0:1]              # (1,1) left-linear bias
    S = slab_ref[r_S:r_S + B, 0:BN]                  # (B, BN) segment-sum matrix

    def mm(x, y):
        return jnp.dot(x, y, preferred_element_type=jnp.float32)

    # ---- GCN layers (dropout p=0 -> identity). A@x0 is cached for pooling. ----
    ax0 = mm(A, x0)                                  # (BN, F)
    h = srss(mm(ax0, w1) + b1)                       # (BN, D)
    h = srss(mm(mm(A, h), w2) + b2)                  # (BN, D)
    h = srss(mm(mm(A, h), w3) + b3)                  # (BN, D)

    # ---- QGCN last layer (transpose-free):
    #   (A^T x1 W_l + b_l)^T x0 == sum_n (x1 W_l)[n]*(A x0)[n] + b_l*sum_n x0[n]
    hw = mm(h, wl)                                   # (BN, 1)
    pooled = mm(S, hw * ax0 + bl * x0)               # (B, F) per-graph segment sums
    out_ref[...] = mm(pooled, wr) + br               # (B, C_pad) lane-dense store


def qgcn_forward(A, x0, params):
    B, N, _ = A.shape
    F = x0.shape[-1]
    D = params["w1"].shape[1]
    C = params["wr"].shape[1]
    BN = B * N
    C_pad = _rup(C, 128)
    W = max(128, _rup(D, 128), C_pad, _rup(BN, 128))  # slab lane width

    # ---- row layout of the packed parameter slab (all offsets 8-aligned) ----
    r_w1 = 0
    r_w2 = r_w1 + _rup(F, 8)
    r_w3 = r_w2 + _rup(D, 8)
    r_wl = r_w3 + _rup(D, 8)
    r_wr = r_wl + _rup(D, 8)
    r_b = r_wr + _rup(F, 8)          # rows r_b..r_b+4: b1, b2, b3, br, bl
    r_S = _rup(r_b + 5, 8)
    R = _rup(r_S + B, 8)

    slab = jnp.zeros((R, W), jnp.float32)
    slab = slab.at[r_w1:r_w1 + F, :D].set(params["w1"])
    slab = slab.at[r_w2:r_w2 + D, :D].set(params["w2"])
    slab = slab.at[r_w3:r_w3 + D, :D].set(params["w3"])
    slab = slab.at[r_wl:r_wl + D, :1].set(params["wl"])
    slab = slab.at[r_wr:r_wr + F, :C].set(params["wr"])
    slab = slab.at[r_b + 0, :D].set(params["b1"][0])
    slab = slab.at[r_b + 1, :D].set(params["b2"][0])
    slab = slab.at[r_b + 2, :D].set(params["b3"][0])
    slab = slab.at[r_b + 3, :C].set(params["br"][0])
    slab = slab.at[r_b + 4, 0].set(params["bl"][0, 0])
    # Segment-sum matrix: S[b, n] = 1 iff flat node n belongs to graph b.
    seg = (jnp.arange(B)[:, None] == (jnp.arange(BN)[None, :] // N))
    slab = slab.at[r_S:r_S + B, :BN].set(seg.astype(jnp.float32))

    # Block-diagonal adjacency (exact zeros off-diagonal) and flattened features.
    A_bd = (jnp.eye(B, dtype=jnp.float32)[:, None, :, None]
            * A[:, :, None, :]).reshape(BN, BN)
    x0f = x0.reshape(BN, F)

    # VMEM budget check (v7x: 32 MiB scoped default of 64 MiB physical).
    in_bytes = 4 * (A_bd.size + x0f.size + slab.size)
    out_bytes = 4 * B * C_pad
    assert 2 * in_bytes + out_bytes < 24 * 1024 * 1024, (
        "inputs too large for single-shot VMEM residency; re-tile over graphs")

    flops = (2 * BN * BN * (F + 2 * D)          # three block-diag A matmuls
             + 2 * BN * (F * D + 2 * D * D)     # dense layers 1-3
             + 2 * BN * D                       # left linear (D -> 1)
             + 2 * B * BN * F                   # segment-sum pooling
             + 2 * B * F * C_pad)               # right linear
    ce = pl.CostEstimate(flops=flops, transcendentals=0,
                         bytes_accessed=in_bytes + out_bytes)

    kernel = functools.partial(
        qgcn_kernel, F=F, D=D, C_pad=C_pad, B=B, BN=BN,
        r_w1=r_w1, r_w2=r_w2, r_w3=r_w3, r_wl=r_wl, r_wr=r_wr, r_b=r_b, r_S=r_S)

    out = pl.pallas_call(
        kernel,
        out_shape=jax.ShapeDtypeStruct((B, C_pad), jnp.float32),
        in_specs=[pl.BlockSpec((BN, BN), lambda: (0, 0)),
                  pl.BlockSpec((BN, F), lambda: (0, 0)),
                  pl.BlockSpec((R, W), lambda: (0, 0))],
        out_specs=pl.BlockSpec((B, C_pad), lambda: (0, 0)),
        cost_estimate=ce,
    )(A_bd, x0f, slab)

    # (B, C_pad) lane-dense slab -> (B, C); matches torch .squeeze(dim=1)
    return out[:, :C]


def init_params(key, num_of_features, inside_dim, out_dim):
    """Deterministic init mirroring the module's reset_parameters shapes/scales."""
    ks = jax.random.split(key, 10)

    def u(k, shape, stdv):
        return jax.random.uniform(k, shape, jnp.float32, -stdv, stdv)

    F, D, C = num_of_features, inside_dim, out_dim
    return dict(
        # GCN weights: uniform(-1/sqrt(out_dim)); biases keep torch default 1/sqrt(in_dim)
        w1=u(ks[0], (F, D), 1.0 / math.sqrt(D)),
        b1=u(ks[1], (1, D), 1.0 / math.sqrt(F)),
        w2=u(ks[2], (D, D), 1.0 / math.sqrt(D)),
        b2=u(ks[3], (1, D), 1.0 / math.sqrt(D)),
        w3=u(ks[4], (D, D), 1.0 / math.sqrt(D)),
        b3=u(ks[5], (1, D), 1.0 / math.sqrt(D)),
        # QGCN last layer: left_linear (D->1), right_linear (F->C)
        wl=u(ks[6], (D, 1), 1.0),
        bl=u(ks[7], (1, 1), 1.0 / math.sqrt(D)),
        wr=u(ks[8], (F, C), 1.0 / math.sqrt(C)),
        br=u(ks[9], (1, C), 1.0 / math.sqrt(F)),
    )


def ref_forward(A, x0, p):
    """Pure-JAX reference matching the PyTorch forward semantics (dropout p=0)."""
    h = x0
    for w, b in ((p["w1"], p["b1"]), (p["w2"], p["b2"]), (p["w3"], p["b3"])):
        h = srss(jnp.einsum("bij,bjf->bif", A, h) @ w + b)
    # x1_A = x1^T A ; left = x1_A^T W_l + b_l = (A^T x1) W_l + b_l
    left = jnp.einsum("bji,bjd->bid", A, h) @ p["wl"] + p["bl"]     # (B, N, 1)
    pooled = jnp.einsum("bni,bnf->bif", left, x0)                   # (B, 1, F)
    out = pooled @ p["wr"] + p["br"]                                # (B, 1, C)
    return out[:, 0, :]                                             # squeeze(dim=1)


if __name__ == "__main__":
    # Small shapes: batch=8 graphs, 16 nodes, 8 features/node, inside_dim=32,
    # number_of_classes=2 (binary) -> out_dim=1.
    B, N, F, D = 8, 16, 8, 32
    num_classes = 2
    C = 1 if num_classes == 2 else num_classes

    key = jax.random.PRNGKey(0)
    k_a, k_x, k_p = jax.random.split(key, 3)
    A = jax.random.uniform(k_a, (B, N, N), jnp.float32)
    x0 = jax.random.normal(k_x, (B, N, F), jnp.float32)
    params = init_params(k_p, F, D, C)

    out = jax.block_until_ready(qgcn_forward(A, x0, params))
    ref = jax.block_until_ready(ref_forward(A, x0, params))

    assert out.shape == (B, C), out.shape
    assert jnp.allclose(out, ref, atol=1e-3, rtol=1e-4), (out, ref)

    print("KERNEL_OK")
</pallas_src>

<mosaic_0001>
module attributes {stable_mosaic.version = 11 : i64} {
  func.func @qgcn_kernel(%arg0: memref<128x128xf32, #tpu.memory_space<vmem>>, %arg1: memref<128x8xf32, #tpu.memory_space<vmem>>, %arg2: memref<128x128xf32, #tpu.memory_space<vmem>>, %arg3: memref<8x128xf32, #tpu.memory_space<vmem>>) attributes {dimension_semantics = [], scalar_prefetch = 0 : i64, scratch_operands = 0 : i64, tpu.core_type = #tpu.core_type<tc>} {
    %c0 = arith.constant 0 : index
    %c0_0 = arith.constant 0 : index
    %0 = vector.load %arg0[%c0, %c0_0] : memref<128x128xf32, #tpu.memory_space<vmem>>, vector<128x128xf32>
    %c0_1 = arith.constant 0 : index
    %c0_2 = arith.constant 0 : index
    %1 = vector.load %arg1[%c0_1, %c0_2] : memref<128x8xf32, #tpu.memory_space<vmem>>, vector<128x8xf32>
    %c0_3 = arith.constant 0 : index
    %c0_4 = arith.constant 0 : index
    %2 = vector.load %arg2[%c0_3, %c0_4] : memref<128x128xf32, #tpu.memory_space<vmem>>, vector<8x32xf32>
    %c8 = arith.constant 8 : index
    %c0_5 = arith.constant 0 : index
    %3 = vector.load %arg2[%c8, %c0_5] : memref<128x128xf32, #tpu.memory_space<vmem>>, vector<32x32xf32>
    %c40 = arith.constant 40 : index
    %c0_6 = arith.constant 0 : index
    %4 = vector.load %arg2[%c40, %c0_6] : memref<128x128xf32, #tpu.memory_space<vmem>>, vector<32x32xf32>
    %c72 = arith.constant 72 : index
    %c0_7 = arith.constant 0 : index
    %5 = vector.load %arg2[%c72, %c0_7] : memref<128x128xf32, #tpu.memory_space<vmem>>, vector<32x1xf32>
    %c104 = arith.constant 104 : index
    %c0_8 = arith.constant 0 : index
    %6 = vector.load %arg2[%c104, %c0_8] : memref<128x128xf32, #tpu.memory_space<vmem>>, vector<8x128xf32>
    %c112 = arith.constant 112 : index
    %c0_9 = arith.constant 0 : index
    %7 = vector.load %arg2[%c112, %c0_9] : memref<128x128xf32, #tpu.memory_space<vmem>>, vector<1x32xf32>
    %c113 = arith.constant 113 : index
    %c0_10 = arith.constant 0 : index
    %8 = vector.load %arg2[%c113, %c0_10] : memref<128x128xf32, #tpu.memory_space<vmem>>, vector<1x32xf32>
    %c114 = arith.constant 114 : index
    %c0_11 = arith.constant 0 : index
    %9 = vector.load %arg2[%c114, %c0_11] : memref<128x128xf32, #tpu.memory_space<vmem>>, vector<1x32xf32>
    %c115 = arith.constant 115 : index
    %c0_12 = arith.constant 0 : index
    %10 = vector.load %arg2[%c115, %c0_12] : memref<128x128xf32, #tpu.memory_space<vmem>>, vector<1x128xf32>
    %c116 = arith.constant 116 : index
    %c0_13 = arith.constant 0 : index
    %11 = vector.load %arg2[%c116, %c0_13] : memref<128x128xf32, #tpu.memory_space<vmem>>, vector<1x1xf32>
    %c120 = arith.constant 120 : index
    %c0_14 = arith.constant 0 : index
    %12 = vector.load %arg2[%c120, %c0_14] : memref<128x128xf32, #tpu.memory_space<vmem>>, vector<8x128xf32>
    %cst = arith.constant dense<0.000000e+00> : vector<128x8xf32>
    %13 = tpu.matmul %0, %1, %cst {dimension_numbers = #tpu.dot_dimension_numbers<[1], [0], [0], [1], [0, 0, 1, 1], [], []>} : vector<128x128xf32>, vector<128x8xf32>, vector<128x8xf32> -> vector<128x8xf32>
    %cst_15 = arith.constant dense<0.000000e+00> : vector<128x32xf32>
    %14 = tpu.matmul %13, %2, %cst_15 {dimension_numbers = #tpu.dot_dimension_numbers<[1], [0], [0], [1], [0, 0, 1, 1], [], []>} : vector<128x8xf32>, vector<8x32xf32>, vector<128x32xf32> -> vector<128x32xf32>
    %15 = vector.broadcast %7 : vector<1x32xf32> to vector<128x32xf32>
    %16 = arith.addf %14, %15 : vector<128x32xf32>
    %17 = arith.mulf %16, %16 : vector<128x32xf32>
    %cst_16 = arith.constant 1.000000e+00 : f32
    %18 = vector.broadcast %cst_16 : f32 to vector<128x32xf32>
    %19 = arith.addf %17, %18 : vector<128x32xf32>
    %cst_17 = arith.constant 2.000000e+00 : f32
    %20 = vector.broadcast %cst_17 : f32 to vector<128x32xf32>
    %21 = arith.divf %20, %19 : vector<128x32xf32>
    %cst_18 = arith.constant 1.000000e+00 : f32
    %22 = vector.broadcast %cst_18 : f32 to vector<128x32xf32>
    %23 = arith.subf %22, %21 : vector<128x32xf32>
    %cst_19 = arith.constant dense<0.000000e+00> : vector<128x32xf32>
    %24 = tpu.matmul %0, %23, %cst_19 {dimension_numbers = #tpu.dot_dimension_numbers<[1], [0], [0], [1], [0, 0, 1, 1], [], []>} : vector<128x128xf32>, vector<128x32xf32>, vector<128x32xf32> -> vector<128x32xf32>
    %cst_20 = arith.constant dense<0.000000e+00> : vector<128x32xf32>
    %25 = tpu.matmul %24, %3, %cst_20 {dimension_numbers = #tpu.dot_dimension_numbers<[1], [0], [0], [1], [0, 0, 1, 1], [], []>} : vector<128x32xf32>, vector<32x32xf32>, vector<128x32xf32> -> vector<128x32xf32>
    %26 = vector.broadcast %8 : vector<1x32xf32> to vector<128x32xf32>
    %27 = arith.addf %25, %26 : vector<128x32xf32>
    %28 = arith.mulf %27, %27 : vector<128x32xf32>
    %cst_21 = arith.constant 1.000000e+00 : f32
    %29 = vector.broadcast %cst_21 : f32 to vector<128x32xf32>
    %30 = arith.addf %28, %29 : vector<128x32xf32>
    %cst_22 = arith.constant 2.000000e+00 : f32
    %31 = vector.broadcast %cst_22 : f32 to vector<128x32xf32>
    %32 = arith.divf %31, %30 : vector<128x32xf32>
    %cst_23 = arith.constant 1.000000e+00 : f32
    %33 = vector.broadcast %cst_23 : f32 to vector<128x32xf32>
    %34 = arith.subf %33, %32 : vector<128x32xf32>
    %cst_24 = arith.constant dense<0.000000e+00> : vector<128x32xf32>
    %35 = tpu.matmul %0, %34, %cst_24 {dimension_numbers = #tpu.dot_dimension_numbers<[1], [0], [0], [1], [0, 0, 1, 1], [], []>} : vector<128x128xf32>, vector<128x32xf32>, vector<128x32xf32> -> vector<128x32xf32>
    %cst_25 = arith.constant dense<0.000000e+00> : vector<128x32xf32>
    %36 = tpu.matmul %35, %4, %cst_25 {dimension_numbers = #tpu.dot_dimension_numbers<[1], [0], [0], [1], [0, 0, 1, 1], [], []>} : vector<128x32xf32>, vector<32x32xf32>, vector<128x32xf32> -> vector<128x32xf32>
    %37 = vector.broadcast %9 : vector<1x32xf32> to vector<128x32xf32>
    %38 = arith.addf %36, %37 : vector<128x32xf32>
    %39 = arith.mulf %38, %38 : vector<128x32xf32>
    %cst_26 = arith.constant 1.000000e+00 : f32
    %40 = vector.broadcast %cst_26 : f32 to vector<128x32xf32>
    %41 = arith.addf %39, %40 : vector<128x32xf32>
    %cst_27 = arith.constant 2.000000e+00 : f32
    %42 = vector.broadcast %cst_27 : f32 to vector<128x32xf32>
    %43 = arith.divf %42, %41 : vector<128x32xf32>
    %cst_28 = arith.constant 1.000000e+00 : f32
    %44 = vector.broadcast %cst_28 : f32 to vector<128x32xf32>
    %45 = arith.subf %44, %43 : vector<128x32xf32>
    %cst_29 = arith.constant dense<0.000000e+00> : vector<128x1xf32>
    %46 = tpu.matmul %45, %5, %cst_29 {dimension_numbers = #tpu.dot_dimension_numbers<[1], [0], [0], [1], [0, 0, 1, 1], [], []>} : vector<128x32xf32>, vector<32x1xf32>, vector<128x1xf32> -> vector<128x1xf32>
    %47 = vector.broadcast %46 : vector<128x1xf32> to vector<128x8xf32>
    %48 = arith.mulf %47, %13 : vector<128x8xf32>
    %49 = vector.broadcast %11 : vector<1x1xf32> to vector<128x8xf32>
    %50 = arith.mulf %49, %1 : vector<128x8xf32>
    %51 = arith.addf %48, %50 : vector<128x8xf32>
    %cst_30 = arith.constant dense<0.000000e+00> : vector<8x8xf32>
    %52 = tpu.matmul %12, %51, %cst_30 {dimension_numbers = #tpu.dot_dimension_numbers<[1], [0], [0], [1], [0, 0, 1, 1], [], []>} : vector<8x128xf32>, vector<128x8xf32>, vector<8x8xf32> -> vector<8x8xf32>
    %cst_31 = arith.constant dense<0.000000e+00> : vector<8x128xf32>
    %53 = tpu.matmul %52, %6, %cst_31 {dimension_numbers = #tpu.dot_dimension_numbers<[1], [0], [0], [1], [0, 0, 1, 1], [], []>} : vector<8x8xf32>, vector<8x128xf32>, vector<8x128xf32> -> vector<8x128xf32>
    %54 = vector.broadcast %10 : vector<1x128xf32> to vector<8x128xf32>
    %55 = arith.addf %53, %54 : vector<8x128xf32>
    %c0_32 = arith.constant 0 : index
    %c0_33 = arith.constant 0 : index
    %56 = vector.load %arg3[%c0_32, %c0_33] : memref<8x128xf32, #tpu.memory_space<vmem>>, vector<8x128xf32>
    tpu.vector_store %arg3[%c0_32, %c0_33], %55 {strides = array<i32>} : memref<8x128xf32, #tpu.memory_space<vmem>>, vector<8x128xf32>,
    return
  }
}

</mosaic_0001>

<bundles_post_ra>
// kernel: tpu_custom_call.1
= control target key start
LH: loop header
LB: loop body
LE: loop exit
PB: predicated region body
PF: predicated region fallthrough
CT: control target
= control target key end

     0   :  { %8 = vsyncpa [#allocation3], 0  ;;  %s3382_s0 = inlined_call_operand.vmem [shape: f32[128,128], index: 0, kind: input, shape index: {}]   ;;  %s3383_s1 = inlined_call_operand.vmem [shape: f32[128,8], index: 1, kind: input, shape index: {}]   ;;  %s3384_s2 = inlined_call_operand.hbm [shape: f32[128,128], index: 2, kind: input, shape index: {}]   ;;  %s3385_s3 = inlined_call_operand.hbm [shape: f32[8,128], index: 3, kind: output, shape index: {}]  }
   0x1   :  { %9 = vsyncpa [#allocation4], 0  ;;  %s18_s14 = sshll.u32 %s3384_s2, 4  ;;  %s2068_s15 = smov [#allocation2]   ;;  %s19_s14 = int_to_ptr.hbm [resolvable:$true] %s18_s14 }
   0x2   :  { %s20_s16 = sshll.u32 %s2068_s15, 4  ;;  %s2069_s17 = smov 128   ;;  %s21_s16 = int_to_ptr.vmem [resolvable:$true] %s20_s16 }
   0x3   :  { %s2070_s18 = smov 8  }
   0x4   :  { %26 = dma.hbm_to_vmem [thread:$0]  %s19_s14, 2048, %s21_s16, [#allocation3], %s2069_s17, %s2069_s17, %s2070_s18  }
   0x5   :  { %2064 = dma.done.wait [#allocation3], 2048  }
   0x6   :  { %2065 = vsyncadd [#allocation3], 4294965248  ;;  %v62_v0 = vld [vmem:[%s3383_s1 + $0x78] sm:$0xff]  ;;  %v61_v1 = vld [vmem:[%s3383_s1 + $0x70] sm:$0xff]  ;;  %vm3413_vm0 = vcmask 64512   ;;  %s2072_s6 = smov [#allocation5]  }
   0x7   :  { %83 = vmatpush.msra.mxu0 %v62_v0  ;;  %1858 = vmatpush.msra.mxu2 %v62_v0  ;;  %v60_v2 = vld [vmem:[%s3383_s1 + $0x68] sm:$0xff]  ;;  %v59_v3 = vld [vmem:[%s3383_s1 + $0x60] sm:$0xff]  ;;  %v58_v4 = vld [vmem:[%s3383_s1 + $0x58] sm:$0xff]  ;;  %s1781_s7 = sshll.u32 %s2072_s6, 4  ;;  %s1782_s7 = int_to_ptr.vmem [resolvable:$true] %s1781_s7 }
   0x8   :  { %v57_v5 = vld [vmem:[%s3383_s1 + $0x50] sm:$0xff]  ;;  %v56_v6 = vld [vmem:[%s3383_s1 + $0x48] sm:$0xff]  ;;  %v55_v7 = vld [vmem:[%s3383_s1 + $0x40] sm:$0xff] }
   0x9   :  { %84 = vmatpush.msra.mxu0 %v61_v1  ;;  %1859 = vmatpush.msra.mxu2 %v61_v1  ;;  %v54_v8 = vld [vmem:[%s3383_s1 + $0x38] sm:$0xff]  ;;  %v53_v9 = vld [vmem:[%s3383_s1 + $0x30] sm:$0xff]  ;;  %v52_v10 = vld [vmem:[%s3383_s1 + $0x28] sm:$0xff] }
   0xa   :  { %v51_v11 = vld [vmem:[%s3383_s1 + $0x20] sm:$0xff]  ;;  %v50_v12 = vld [vmem:[%s3383_s1 + $0x18] sm:$0xff]  ;;  %v49_v13 = vld [vmem:[%s3383_s1 + $0x10] sm:$0xff] }
   0xb   :  { %85 = vmatpush.msra.mxu0 %v60_v2  ;;  %1860 = vmatpush.msra.mxu2 %v60_v2  ;;  %v48_v14 = vld [vmem:[%s3383_s1 + $0x8] sm:$0xff]  ;;  %v47_v15 = vld [vmem:[%s3383_s1] sm:$0xff]  ;;  %v2159_v18 = vld [vmem:[%s3382_s0 + $0x10] sm:$0xff] }
   0xc   :  { %v2147_v16 = vld [vmem:[%s3382_s0] sm:$0xff]  ;;  %v2153_v17 = vld [vmem:[%s3382_s0 + $0x8] sm:$0xff]  ;;  %v2165_v19 = vld [vmem:[%s3382_s0 + $0x18] sm:$0xff] }
   0xd   :  { %86 = vmatpush.msra.mxu0 %v59_v3  ;;  %1861 = vmatpush.msra.mxu2 %v59_v3  ;;  %v2171_v20 = vld [vmem:[%s3382_s0 + $0x20] sm:$0xff]  ;;  %v2177_v21 = vld [vmem:[%s3382_s0 + $0x28] sm:$0xff]  ;;  %v2183_v22 = vld [vmem:[%s3382_s0 + $0x30] sm:$0xff] }
   0xe   :  { %3415 = vst [vmem:[#allocation8_spill] sm:$0xff] %v2177_v21  ;;  %v2189_v23 = vld [vmem:[%s3382_s0 + $0x58] sm:$0xff]  ;;  %v2200_v25 = vld [vmem:[%s3382_s0 + $0x60] sm:$0xff]  ;;  %v2212_v27 = vld [vmem:[%s3382_s0 + $0x68] sm:$0xff] }
   0xf   :  { %87 = vmatpush.msra.mxu0 %v58_v4  ;;  %1862 = vmatpush.msra.mxu2 %v58_v4  ;;  %3416 = vst [vmem:[#allocation9_spill] sm:$0xff] %v2183_v22  ;;  %v2195_v24 = vld [vmem:[%s3382_s0 + $0x38] sm:$0xff]  ;;  %v2207_v26 = vld [vmem:[%s3382_s0 + $0x40] sm:$0xff]  ;;  %v2219_v28 = vld [vmem:[%s3382_s0 + $0x48] sm:$0xff] }
  0x10   :  { %3417 = vst [vmem:[#allocation10_spill] sm:$0xff] %v2189_v23  ;;  %v2224_v29 = vld [vmem:[%s3382_s0 + $0x70] sm:$0xff]  ;;  %v2236_v31 = vld [vmem:[%s3382_s0 + $0x78] sm:$0xff]  ;;  %v63_v32 = vld [vmem:[#allocation2] sm:$0xff] }
  0x11   :  { %88 = vmatpush.msra.mxu0 %v57_v5  ;;  %1863 = vmatpush.msra.mxu2 %v57_v5  ;;  %3418 = vst [vmem:[#allocation11_spill] sm:$0xff] %v2195_v24  ;;  %v2231_v30 = vld [vmem:[%s3382_s0 + $0x50] sm:$0xff] }
  0x12   :  { %3419 = vst [vmem:[#allocation12_spill] sm:$0xff] %v2200_v25  ;;  %213 = vmatpush.msra.mxu1 %v63_v32  ;;  %v2304_v60 = vld [vmem:[#allocation2 + $0x70] ss:$0 sm:$0xff] }
  0x13   :  { %89 = vmatpush.msra.mxu0 %v56_v6  ;;  %1864 = vmatpush.msra.mxu2 %v56_v6  ;;  %3420 = vst [vmem:[#allocation13_spill] sm:$0xff] %v2207_v26 }
  0x14   :  { %3421 = vst [vmem:[#allocation14_spill] sm:$0xff] %v2212_v27 }
  0x15   :  { %90 = vmatpush.msra.mxu0 %v55_v7  ;;  %1865 = vmatpush.msra.mxu2 %v55_v7  ;;  %3422 = vst [vmem:[#allocation15_spill] sm:$0xff] %v2219_v28 }
  0x16   :  { %3423 = vst [vmem:[#allocation16_spill] sm:$0xff] %v2224_v29 }
  0x17   :  { %91 = vmatpush.msra.mxu0 %v54_v8  ;;  %1866 = vmatpush.msra.mxu2 %v54_v8  ;;  %3424 = vst [vmem:[#allocation17_spill] sm:$0xff] %v2231_v30 }
  0x18   :  { %3425 = vst [vmem:[#allocation18_spill] sm:$0xff] %v2236_v31 }
  0x19   :  { %92 = vmatpush.msra.mxu0 %v53_v9  ;;  %1867 = vmatpush.msra.mxu2 %v53_v9 }
  0x1b   :  { %93 = vmatpush.msra.mxu0 %v52_v10  ;;  %1868 = vmatpush.msra.mxu2 %v52_v10 }
  0x1d   :  { %94 = vmatpush.msra.mxu0 %v51_v11  ;;  %1869 = vmatpush.msra.mxu2 %v51_v11 }
  0x1f   :  { %95 = vmatpush.msra.mxu0 %v50_v12  ;;  %1870 = vmatpush.msra.mxu2 %v50_v12 }
  0x21   :  { %96 = vmatpush.msra.mxu0 %v49_v13  ;;  %1871 = vmatpush.msra.mxu2 %v49_v13 }
  0x23   :  { %97 = vmatpush.msra.mxu0 %v48_v14  ;;  %1872 = vmatpush.msra.mxu2 %v48_v14 }
  0x25   :  { %98 = vmatpush.msra.mxu0 %v47_v15  ;;  %1873 = vmatpush.msra.mxu2 %v47_v15 }
  0x26   :  { %99 = vmatmul.f32.vlgmr.msra.gmra.mxu0 %v2147_v16  ;;  %132 = vmatmul.f32.vlgmr.msra.gmra.mxu2 %v2189_v23 }
  0x2e   :  { %102 = vmatmul.f32.gmra.mxu0 %v2153_v17  ;;  %135 = vmatmul.f32.gmra.mxu2 %v2200_v25 }
  0x36   :  { %105 = vmatmul.f32.gmra.mxu0 %v2159_v18  ;;  %138 = vmatmul.f32.gmra.mxu2 %v2212_v27 }
  0x3e   :  { %108 = vmatmul.f32.gmra.mxu0 %v2165_v19  ;;  %141 = vmatmul.f32.gmra.mxu2 %v2224_v29 }
  0x46   :  { %111 = vmatmul.f32.gmra.mxu0 %v2171_v20  ;;  %144 = vmatmul.f32.gmra.mxu2 %v2236_v31 }
  0x4e   :  { %114 = vmatmul.f32.gmra.mxu0 %v2177_v21 }
  0x56   :  { %117 = vmatmul.f32.gmra.mxu0 %v2183_v22 }
  0x5e   :  { %120 = vmatmul.f32.gmra.mxu0 %v2195_v24 }
  0x66   :  { %123 = vmatmul.f32.gmra.mxu0 %v2207_v26 }
  0x6e   :  { %126 = vmatmul.f32.gmra.mxu0 %v2219_v28 }
  0x76   :  { %129 = vmatmul.f32.gmra.mxu0 %v2231_v30 }
  0xa3   :  { %v2240_v33 = vpop.f32.mrf.mxu0 }
  0xa4   :  { %3426 = vst [vmem:[#allocation19_spill] sm:$0xff] %v2240_v33  ;;  %1793 = vmatmul.msk.f32.vlgmr.msra.gmra.mxu1 %vm3413_vm0, %v2240_v33 }
  0xa9   :  { %v2280_v43 = vpop.f32.mrf.mxu2 }
  0xaa   :  { %3436 = vst [vmem:[#allocation29_spill] sm:$0xff] %v2280_v43 }
  0xab   :  { %v2244_v34 = vpop.f32.mrf.mxu0 }
  0xac   :  { %3427 = vst [vmem:[#allocation20_spill] sm:$0xff] %v2244_v34  ;;  %1794 = vmatmul.msk.f32.gmra.mxu1 %vm3413_vm0, %v2244_v34 }
  0xb1   :  { %v2286_v45 = vpop.f32.mrf.mxu2 }
  0xb2   :  { %3438 = vst [vmem:[#allocation31_spill] sm:$0xff] %v2286_v45 }
  0xb3   :  { %v2248_v35 = vpop.f32.mrf.mxu0 }
  0xb4   :  { %3428 = vst [vmem:[#allocation21_spill] sm:$0xff] %v2248_v35  ;;  %1795 = vmatmul.msk.f32.gmra.mxu1 %vm3413_vm0, %v2248_v35 }
  0xb9   :  { %v2292_v46 = vpop.f32.mrf.mxu2 }
  0xba   :  { %3439 = vst [vmem:[#allocation32_spill] sm:$0xff] %v2292_v46 }
  0xbb   :  { %v2252_v36 = vpop.f32.mrf.mxu0 }
  0xbc   :  { %3429 = vst [vmem:[#allocation22_spill] sm:$0xff] %v2252_v36  ;;  %1796 = vmatmul.msk.f32.gmra.mxu1 %vm3413_vm0, %v2252_v36 }
  0xc1   :  { %v2296_v47 = vpop.f32.mrf.mxu2 }
  0xc2   :  { %3440 = vst [vmem:[#allocation33_spill] sm:$0xff] %v2296_v47 }
  0xc3   :  { %v2256_v37 = vpop.f32.mrf.mxu0 }
  0xc4   :  { %3430 = vst [vmem:[#allocation23_spill] sm:$0xff] %v2256_v37  ;;  %1797 = vmatmul.msk.f32.gmra.mxu1 %vm3413_vm0, %v2256_v37 }
  0xc9   :  { %v2300_v48 = vpop.f32.mrf.mxu2 }
  0xca   :  { %3441 = vst [vmem:[#allocation34_spill] sm:$0xff] %v2300_v48 }
  0xcb   :  { %v2260_v38 = vpop.f32.mrf.mxu0 }
  0xcc   :  { %3431 = vst [vmem:[#allocation24_spill] sm:$0xff] %v2260_v38  ;;  %1798 = vmatmul.msk.f32.gmra.mxu1 %vm3413_vm0, %v2260_v38 }
  0xd3   :  { %v2264_v39 = vpop.f32.mrf.mxu0 }
  0xd4   :  { %3432 = vst [vmem:[#allocation25_spill] sm:$0xff] %v2264_v39  ;;  %1799 = vmatmul.msk.f32.gmra.mxu1 %vm3413_vm0, %v2264_v39 }
  0xdb   :  { %v2268_v40 = vpop.f32.mrf.mxu0 }
  0xdc   :  { %3433 = vst [vmem:[#allocation26_spill] sm:$0xff] %v2268_v40  ;;  %1800 = vmatmul.msk.f32.gmra.mxu1 %vm3413_vm0, %v2268_v40 }
  0xe3   :  { %v2272_v41 = vpop.f32.mrf.mxu0 }
  0xe4   :  { %3434 = vst [vmem:[#allocation27_spill] sm:$0xff] %v2272_v41  ;;  %1801 = vmatmul.msk.f32.gmra.mxu1 %vm3413_vm0, %v2272_v41 }
  0xeb   :  { %v2276_v42 = vpop.f32.mrf.mxu0 }
  0xec   :  { %3435 = vst [vmem:[#allocation28_spill] sm:$0xff] %v2276_v42  ;;  %1802 = vmatmul.msk.f32.gmra.mxu1 %vm3413_vm0, %v2276_v42 }
  0xf3   :  { %v2282_v44 = vpop.f32.mrf.mxu0 }
  0xf4   :  { %3437 = vst [vmem:[#allocation30_spill] sm:$0xff] %v2282_v44  ;;  %1803 = vmatmul.msk.f32.gmra.mxu1 %vm3413_vm0, %v2282_v44 }
  0xfc   :  { %1804 = vmatmul.msk.f32.gmra.mxu1 %vm3413_vm0, %v2280_v43 }
 0x104   :  { %1805 = vmatmul.msk.f32.gmra.mxu1 %vm3413_vm0, %v2286_v45 }
 0x10c   :  { %1806 = vmatmul.msk.f32.gmra.mxu1 %vm3413_vm0, %v2292_v46 }
 0x114   :  { %1807 = vmatmul.msk.f32.gmra.mxu1 %vm3413_vm0, %v2296_v47 }
 0x11c   :  { %1808 = vmatmul.msk.f32.gmra.mxu1 %vm3413_vm0, %v2300_v48 }
 0x121   :  { %v215_v49 = vpop.f32.mrf.mxu1 }
 0x122   :  { %v216_v62 = vadd.f32 %v2304_v60, %v215_v49 }
 0x124   :  { %v263_v1 = vmul.f32 %v216_v62, %v216_v62 }
 0x126   :  { %v2312_v8 = vadd.f32 1.0, %v263_v1 }
 0x128   :  { %1888 = vrcp.f32 %v2312_v8 }
 0x129   :  { %v218_v50 = vpop.f32.mrf.mxu1 }
 0x12a   :  { %v219_v63 = vadd.f32 %v2304_v60, %v218_v50 }
 0x12c   :  { %v264_v2 = vmul.f32 %v219_v63, %v219_v63 }
 0x12e   :  { %v2315_v10 = vadd.f32 1.0, %v264_v2 }
 0x130   :  { %1890 = vrcp.f32 %v2315_v10 }
 0x131   :  { %v221_v51 = vpop.f32.mrf.mxu1 }
 0x132   :  { %v222_v0 = vadd.f32 %v2304_v60, %v221_v51 }
 0x134   :  { %v265_v4 = vmul.f32 %v222_v0, %v222_v0 }
 0x136   :  { %v2318_v13 = vadd.f32 1.0, %v265_v4  ;;  %v2340_v4 = vpop.eup %1888 }
 0x138   :  { %1892 = vrcp.f32 %v2318_v13 }
 0x139   :  { %v224_v52 = vpop.f32.mrf.mxu1 }
 0x13a   :  { %v225_v3 = vadd.f32 %v2304_v60, %v224_v52 }
 0x13c   :  { %v266_v11 = vmul.f32 %v225_v3, %v225_v3 }
 0x13e   :  { %v2325_v52 = vadd.f32 1.0, %v266_v11 }
 0x140   :  { %1894 = vrcp.f32 %v2325_v52 }
 0x141   :  { %v227_v53 = vpop.f32.mrf.mxu1 }
 0x142   :  { %v228_v5 = vadd.f32 %v2304_v60, %v227_v53 }
 0x144   :  { %v267_v14 = vmul.f32 %v228_v5, %v228_v5 }
 0x149   :  { %v230_v54 = vpop.f32.mrf.mxu1 }
 0x14a   :  { %v231_v7 = vadd.f32 %v2304_v60, %v230_v54  ;;  %v2328_v54 = vadd.f32 1.0, %v267_v14 }
 0x14c   :  { %v268_v32 = vmul.f32 %v231_v7, %v231_v7  ;;  %1896 = vrcp.f32 %v2328_v54  ;;  %v2345_v7 = vpop.eup %1890 }
 0x14d   :  { %v2350_v11 = vpop.eup %1892 }
 0x14e   :  { %v2331_v62 = vadd.f32 1.0, %v268_v32 }
 0x150   :  { %1898 = vrcp.f32 %v2331_v62 }
 0x151   :  { %v233_v55 = vpop.f32.mrf.mxu1 }
 0x152   :  { %v234_v9 = vadd.f32 %v2304_v60, %v233_v55 }
 0x154   :  { %v269_v50 = vmul.f32 %v234_v9, %v234_v9 }
 0x156   :  { %v2335_v0 = vadd.f32 1.0, %v269_v50 }
 0x158   :  { %1900 = vrcp.f32 %v2335_v0 }
 0x159   :  { %v236_v56 = vpop.f32.mrf.mxu1 }
 0x15a   :  { %v237_v12 = vadd.f32 %v2304_v60, %v236_v56 }
 0x15c   :  { %v270_v53 = vmul.f32 %v237_v12, %v237_v12 }
 0x15e   :  { %v2338_v2 = vadd.f32 1.0, %v270_v53  ;;  %v296_v53 = vmul.f32 %v2340_v4, %v2312_v8 }
 0x160   :  { %1902 = vrcp.f32 %v2338_v2 }
 0x161   :  { %v239_v57 = vpop.f32.mrf.mxu1 }
 0x162   :  { %v240_v15 = vadd.f32 %v2304_v60, %v239_v57 }
 0x164   :  { %v271_v55 = vmul.f32 %v240_v15, %v240_v15 }
 0x166   :  { %v2343_v5 = vadd.f32 1.0, %v271_v55 }
 0x168   :  { %1904 = vrcp.f32 %v2343_v5 }
 0x169   :  { %v242_v58 = vpop.f32.mrf.mxu1 }
 0x16a   :  { %v243_v49 = vadd.f32 %v2304_v60, %v242_v58 }
 0x16c   :  { %v272_v58 = vmul.f32 %v243_v49, %v243_v49  ;;  %v2361_v49 = vpop.eup %1894 }
 0x16d   :  { %v2369_v55 = vpop.eup %1896 }
 0x171   :  { %v245_v59 = vpop.f32.mrf.mxu1 }
 0x172   :  { %v246_v51 = vadd.f32 %v2304_v60, %v245_v59 }
 0x174   :  { %v273_v1 = vmul.f32 %v246_v51, %v246_v51 }
 0x176   :  { %v2353_v12 = vadd.f32 1.0, %v273_v1  ;;  %v341_v1 = vmul.f32 %v2361_v49, %v2325_v52 }
 0x178   :  { %vm450_vm10 = vweird.f32 %v2353_v12 }
 0x179   :  { %v248_v61 = vpop.f32.mrf.mxu1 }
 0x17a   :  { %v249_v63 = vadd.f32 %v2304_v60, %v248_v61  ;;  %v2348_v61 = vadd.f32 1.0, %v272_v58  ;;  %v2376_v58 = vpop.eup %1898 }
 0x17b   :  { %v371_v38 = vmul.f32 %v2376_v58, %v2331_v62 }
 0x17c   :  { %v274_v9 = vmul.f32 %v249_v63, %v249_v63  ;;  %1906 = vrcp.f32 %v2348_v61 }
 0x17d   :  { %1908 = vrcp.f32 %v2353_v12 }
 0x17e   :  { %v2364_v50 = vadd.f32 1.0, %v274_v9  ;;  %v297_v9 = vsub.f32 1.0, %v296_v53 }
 0x180   :  { %v2408_v41 = vmul.f32 %v2340_v4, %v297_v9  ;;  %vm465_vm4 = vweird.f32 %v2364_v50 }
 0x181   :  { %v251_v6 = vpop.f32.mrf.mxu1 }
 0x182   :  { %v252_v56 = vadd.f32 %v2304_v60, %v251_v6 }
 0x184   :  { %v275_v6 = vmul.f32 %v252_v56, %v252_v56  ;;  %v326_v56 = vmul.f32 %v2350_v11, %v2318_v13 }
 0x186   :  { %v2359_v15 = vadd.f32 1.0, %v275_v6  ;;  %v327_v33 = vsub.f32 1.0, %v326_v56 }
 0x188   :  { %v2416_v53 = vmul.f32 %v2350_v11, %v327_v33  ;;  %v372_v33 = vsub.f32 1.0, %v371_v38  ;;  %vm480_vm1 = vweird.f32 %v2359_v15 }
 0x189   :  { %v254_v57 = vpop.f32.mrf.mxu1 }
 0x18a   :  { %v255_v59 = vadd.f32 %v2304_v60, %v254_v57  ;;  %v311_v57 = vmul.f32 %v2345_v7, %v2315_v10  ;;  %v2452_v28 = vmul.f32 %v2376_v58, %v372_v33 }
 0x18c   :  { %v276_v3 = vmul.f32 %v255_v59, %v255_v59  ;;  %v2379_v59 = vpop.eup %1900  ;;  %v312_v34 = vsub.f32 1.0, %v311_v57 }
 0x18d   :  { %v386_v57 = vmul.f32 %v2379_v59, %v2335_v0 }
 0x18e   :  { %v2356_v14 = vadd.f32 1.0, %v276_v3  ;;  %v2384_v3 = vpop.eup %1902 }
 0x18f   :  { %v401_v44 = vmul.f32 %v2384_v3, %v2338_v2  ;;  %v387_v45 = vsub.f32 1.0, %v386_v57  ;;  %vm406_vm0 = vweird.f32 %v2384_v3 }
 0x190   :  { %1910 = vrcp.f32 %v2356_v14  ;;  %vm495_vm6 = vweird.f32 %v2356_v14 }
 0x191   :  { %v257_v32 = vpop.f32.mrf.mxu1  ;;  %1912 = vrcp.f32 %v2359_v15  ;;  %v402_v29 = vsub.f32 1.0, %v401_v44 }
 0x192   :  { %v258_v51 = vadd.f32 %v2304_v60, %v257_v32  ;;  %1914 = vrcp.f32 %v2364_v50  ;;  %v2389_v32 = vpop.eup %1904 }
 0x193   :  { %v2391_v36 = vpop.eup %1906  ;;  %v416_v9 = vmul.f32 %v2389_v32, %v2343_v5 }
 0x194   :  { %v277_v63 = vmul.f32 %v258_v51, %v258_v51  ;;  %v356_v51 = vmul.f32 %v2369_v55, %v2328_v54  ;;  %v2396_v35 = vpop.eup %1908  ;;  %vm436_vm11 = vweird.f32 %v2391_v36 }
 0x195   :  { %vm451_vm5 = vweird.f32 %v2396_v35 }
 0x196   :  { %v2387_v6 = vadd.f32 1.0, %v277_v63  ;;  %v342_v63 = vsub.f32 1.0, %v341_v1  ;;  %v2401_v39 = vpop.eup %1910  ;;  %v357_v40 = vsub.f32 1.0, %v356_v51  ;;  %v431_v1 = vmul.f32 %v2391_v36, %v2348_v61 }
 0x197   :  { %v2410_v42 = vpop.eup %1912  ;;  %v491_v46 = vmul.f32 %v2401_v39, %v2356_v14  ;;  %v446_v51 = vmul.f32 %v2396_v35, %v2353_v12  ;;  %vm496_vm7 = vweird.f32 %v2401_v39 }
 0x198   :  { %1916 = vrcp.f32 %v2387_v6  ;;  %v2431_v48 = vmul.f32 %v2361_v49, %v342_v63  ;;  %v2449_v25 = vmul.f32 %v2369_v55, %v357_v40  ;;  %v432_v57 = vsub.f32 1.0, %v431_v1 }
 0x199   :  { %v260_v37 = vpop.f32.mrf.mxu1  ;;  %v492_v30 = vsub.f32 1.0, %v491_v46  ;;  %v447_v24 = vsub.f32 1.0, %v446_v51  ;;  %v2456_v63 = vmul.f32 %v2379_v59, %v387_v45  ;;  %v2461_v40 = vmul.f32 %v2384_v3, %v402_v29 }
 0x19a   :  { %v261_v56 = vadd.f32 %v2304_v60, %v260_v37  ;;  %v2419_v37 = vmul.f32 %v2345_v7, %v312_v34  ;;  %v2421_v60 = vpop.eup %1914  ;;  %v433_v51 = vmul.f32 %v2391_v36, %v432_v57  ;;  %vm481_vm8 = vweird.f32 %v2410_v42 }
 0x19b   :  { %v461_v38 = vmul.f32 %v2421_v60, %v2364_v50  ;;  %v493_v45 = vmul.f32 %v2401_v39, %v492_v30  ;;  %vm466_vm2 = vweird.f32 %v2421_v60  ;;  %v448_v44 = vmul.f32 %v2396_v35, %v447_v24 }
 0x19c   :  { %v278_v43 = vmul.f32 %v261_v56, %v261_v56  ;;  %v476_v56 = vmul.f32 %v2410_v42, %v2359_v15  ;;  %vm510_vm9 = vweird.f32 %v2387_v6  ;;  %v514_v57 = vand.u32 2147483647, %v2387_v6 }
 0x19d   :  { %v462_v22 = vsub.f32 1.0, %v461_v38  ;;  %v449_v21 = vadd.f32 %v2396_v35, %v448_v44 }
 0x19e   :  { %v2433_v34 = vpop.eup %1916  ;;  %v2435_v47 = vadd.f32 1.0, %v278_v43  ;;  %v417_v43 = vsub.f32 1.0, %v416_v9  ;;  %v477_v26 = vsub.f32 1.0, %v476_v56 }
 0x19f   :  { %v506_v31 = vmul.f32 %v2433_v34, %v2387_v6  ;;  %vm511_vm3 = vweird.f32 %v2433_v34  ;;  %v463_v30 = vmul.f32 %v2421_v60, %v462_v22 }
 0x1a0   :  { %1918 = vrcp.f32 %v2435_v47  ;;  %v2467_v33 = vmul.f32 %v2389_v32, %v417_v43  ;;  %v478_v29 = vmul.f32 %v2410_v42, %v477_v26  ;;  %v516_v26 = vand.u32 2147483648, %v2387_v6  ;;  %vm2495_vm12 = vmor %vm510_vm9, %vm511_vm3 }
 0x1a1   :  { %v507_v23 = vsub.f32 1.0, %v506_v31  ;;  %v531_v22 = vand.u32 2147483648, %v2435_v47  ;;  %v501_v31 = vand.u32 2147483648, %v2356_v14  ;;  %vm2512_vm3 = vmor %vm495_vm6, %vm496_vm7  ;;  %v464_v1 = vadd.f32 %v2421_v60, %v463_v30 }
 0x1a2   :  { %v479_v6 = vadd.f32 %v2410_v42, %v478_v29  ;;  %v484_v29 = vand.u32 2147483647, %v2359_v15  ;;  %vm525_vm9 = vweird.f32 %v2435_v47  ;;  %vm2527_vm6 = vmor %vm480_vm1, %vm481_vm8  ;;  %vm420_vm7 = vweird.f32 %v2343_v5 }
 0x1a3   :  { %v508_v9 = vmul.f32 %v2433_v34, %v507_v23  ;;  %v517_v23 = vor.u32 1.1754944e-38, %v516_v26  ;;  %v502_v30 = vor.u32 1.1754944e-38, %v501_v31  ;;  %vm405_vm1 = vweird.f32 %v2338_v2 }
 0x1a4   :  { %vm391_vm8 = vweird.f32 %v2379_v59  ;;  %v434_v31 = vadd.f32 %v2391_v36, %v433_v51 }
 0x1a5   :  { %v509_v27 = vadd.f32 %v2433_v34, %v508_v9  ;;  %v494_v9 = vadd.f32 %v2401_v39, %v493_v45  ;;  %v529_v45 = vand.u32 2147483647, %v2435_v47 }
 0x1a6   :  { %v1919_v38 = vpop.eup %1918 }
 0x1a7   :  { %v521_v43 = vmul.f32 %v1919_v38, %v2435_v47  ;;  %vm526_vm13 = vweird.f32 %v1919_v38  ;;  %v513_v56 = vsel %vm2495_vm12, %v2433_v34, %v509_v27  ;;  %vm515_vm12 = vcmp.eq.f32.partialorder %v514_v57, 8.507059e+37 }
 0x1a8   :  { %v498_v34 = vsel %vm2512_vm3, %v2401_v39, %v494_v9  ;;  %vm527_vm15 = vmor %vm525_vm9, %vm526_vm13  ;;  %v532_v47 = vor.u32 1.1754944e-38, %v531_v22  ;;  %vm530_vm3 = vcmp.eq.f32.partialorder %v529_v45, 8.507059e+37  ;;  %vm376_vm9 = vweird.f32 %v2376_v58 }
 0x1a9   :  { %v522_v24 = vsub.f32 1.0, %v521_v43  ;;  %v499_v43 = vand.u32 2147483647, %v2356_v14  ;;  %vm2544_vm13 = vmor %vm465_vm4, %vm466_vm2  ;;  %v3450_v22 = vand.u32 2147483648, %v2364_v50 }
 0x1aa   :  { %vm2560_vm2 = vmor %vm450_vm10, %vm451_vm5  ;;  %vm361_vm5 = vweird.f32 %v2369_v55  ;;  %vm3455_vm10 = vweird.f32 %v2348_v61 }
 0x1ab   :  { %v523_v46 = vmul.f32 %v1919_v38, %v522_v24  ;;  %v486_v24 = vand.u32 2147483648, %v2359_v15  ;;  %vm500_vm14 = vcmp.eq.f32.partialorder %v499_v43, 8.507059e+37  ;;  %v483_v15 = vsel %vm2527_vm6, %v2410_v42, %v479_v6  ;;  %vm2580_vm6 = vmor %vm3455_vm10, %vm436_vm11 }
 0x1ac   :  { %v503_v57 = vsel %vm500_vm14, %v502_v30, %v498_v34  ;;  %v468_v42 = vsel %vm2544_vm13, %v2421_v60, %v464_v1  ;;  %vm390_vm14 = vweird.f32 %v2335_v0  ;;  %v472_v43 = vor.u32 1.1754944e-38, %v3450_v22 }
 0x1ad   :  { %v524_v27 = vadd.f32 %v1919_v38, %v523_v46  ;;  %v518_v46 = vsel %vm515_vm12, %v517_v23, %v513_v56  ;;  %v487_v9 = vor.u32 1.1754944e-38, %v486_v24  ;;  %v441_v6 = vand.u32 2147483648, %v2348_v61 }
 0x1ae   :  { %v519_v23 = vmul.f32 2.0, %v518_v46  ;;  %v419_v60 = vadd.f32 %v2389_v32, %v2467_v33  ;;  %v3453_v24 = vand.u32 2147483647, %v2364_v50  ;;  %v453_v1 = vsel %vm2560_vm2, %v2396_v35, %v449_v21 }
 0x1af   :  { %v528_v39 = vsel %vm527_vm15, %v1919_v38, %v524_v27  ;;  %vm485_vm15 = vcmp.eq.f32.partialorder %v484_v29, 8.507059e+37  ;;  %v504_v29 = vmul.f32 2.0, %v503_v57  ;;  %vm375_vm12 = vweird.f32 %v2331_v62 }
 0x1b0   :  { %v533_v26 = vsel %vm530_vm3, %v532_v47, %v528_v39  ;;  %v488_v38 = vsel %vm485_vm15, %v487_v9, %v483_v15  ;;  %vm470_vm4 = vcmp.eq.f32.partialorder %v3453_v24, 8.507059e+37  ;;  %v3454_v34 = vand.u32 2147483648, %v2353_v12 }
 0x1b1   :  { %v534_v56 = vmul.f32 2.0, %v533_v26  ;;  %v473_v27 = vsel %vm470_vm4, %v472_v43, %v468_v42  ;;  %v426_v50 = vand.u32 2147483648, %v2343_v5  ;;  %v404_v35 = vadd.f32 %v2384_v3, %v2461_v40 }
 0x1b2   :  { %v457_v14 = vor.u32 1.1754944e-38, %v3454_v34  ;;  %v549_v47 = vsub.f32 1.0, %v519_v23  ;;  %v489_v46 = vmul.f32 2.0, %v488_v38  ;;  %v3458_v30 = vand.u32 2147483647, %v2353_v12 }
 0x1b3   :  { %v550_v45 = vsub.f32 1.0, %v534_v56  ;;  %v438_v21 = vsel %vm2580_vm6, %v2391_v36, %v434_v31  ;;  %vm360_vm11 = vweird.f32 %v2328_v54  ;;  %vm346_vm13 = vweird.f32 %v2361_v49  ;;  %vm2616_vm6 = vmor %vm405_vm1, %vm406_vm0 }
 0x1b4   :  { %vm455_vm3 = vcmp.eq.f32.partialorder %v3458_v30, 8.507059e+37  ;;  %v442_v15 = vor.u32 1.1754944e-38, %v441_v6  ;;  %vm3459_vm15 = vweird.f32 %v2389_v32  ;;  %v411_v12 = vand.u32 2147483648, %v2338_v2 }
 0x1b5   :  { %551 = vmatpush.msrb.mxu2 %v550_v45  ;;  %v458_v39 = vsel %vm455_vm3, %v457_v14, %v453_v1  ;;  %vm2598_vm2 = vmor %vm420_vm7, %vm3459_vm15  ;;  %v389_v26 = vadd.f32 %v2379_v59, %v2456_v63  ;;  %v548_v36 = vsub.f32 1.0, %v504_v29  ;;  %v474_v57 = vmul.f32 2.0, %v473_v27 }
 0x1b6   :  { %v3462_v9 = vand.u32 2147483647, %v2348_v61  ;;  %v423_v44 = vsel %vm2598_vm2, %v2389_v32, %v419_v60  ;;  %vm345_vm7 = vweird.f32 %v2325_v52  ;;  %vm331_vm10 = vweird.f32 %v2350_v11  ;;  %vm2634_vm15 = vmor %vm390_vm14, %vm391_vm8 }
 0x1b7   :  { %552 = vmatpush.msrb.mxu2 %v549_v47  ;;  %v427_v56 = vor.u32 1.1754944e-38, %v426_v50  ;;  %v396_v61 = vand.u32 2147483648, %v2335_v0  ;;  %v374_v23 = vadd.f32 %v2376_v58, %v2452_v28  ;;  %v547_v32 = vsub.f32 1.0, %v489_v46 }
 0x1b8   :  { %vm440_vm4 = vcmp.eq.f32.partialorder %v3462_v9, 8.507059e+37  ;;  %v459_v42 = vmul.f32 2.0, %v458_v39  ;;  %v3465_v38 = vand.u32 2147483647, %v2343_v5  ;;  %v408_v22 = vsel %vm2616_vm6, %v2384_v3, %v404_v35 }
 0x1b9   :  { %v443_v31 = vsel %vm440_vm4, %v442_v15, %v438_v21  ;;  %553 = vmatpush.msrb.mxu2 %v548_v36  ;;  %vm330_vm0 = vweird.f32 %v2318_v13  ;;  %vm316_vm1 = vweird.f32 %v2345_v7  ;;  %v412_v51 = vor.u32 1.1754944e-38, %v411_v12  ;;  %vm2652_vm4 = vmor %vm375_vm12, %vm376_vm9 }
 0x1ba   :  { %vm425_vm3 = vcmp.eq.f32.partialorder %v3465_v38, 8.507059e+37  ;;  %v381_v5 = vand.u32 2147483648, %v2331_v62  ;;  %v359_v6 = vadd.f32 %v2369_v55, %v2449_v25  ;;  %v546_v3 = vsub.f32 1.0, %v474_v57  ;;  %vm2669_vm12 = vmor %vm360_vm11, %vm361_vm5 }
 0x1bb   :  { %v428_v43 = vsel %vm425_vm3, %v427_v56, %v423_v44  ;;  %554 = vmatpush.msrb.mxu2 %v547_v32  ;;  %v444_v60 = vmul.f32 2.0, %v443_v31  ;;  %v3468_v45 = vand.u32 2147483647, %v2338_v2  ;;  %v393_v29 = vsel %vm2634_vm15, %v2379_v59, %v389_v26  ;;  %vm2685_vm5 = vmor %vm345_vm7, %vm346_vm13 }
 0x1bc   :  { %vm315_vm8 = vweird.f32 %v2315_v10  ;;  %vm301_vm14 = vweird.f32 %v2340_v4  ;;  %v397_v1 = vor.u32 1.1754944e-38, %v396_v61  ;;  %v366_v2 = vand.u32 2147483648, %v2328_v54  ;;  %vm2701_vm13 = vmor %vm330_vm0, %vm331_vm10 }
 0x1bd   :  { %vm410_vm2 = vcmp.eq.f32.partialorder %v3468_v45, 8.507059e+37  ;;  %v344_v27 = vadd.f32 %v2361_v49, %v2431_v48  ;;  %555 = vmatpush.msrb.mxu2 %v546_v3  ;;  %v545_v59 = vsub.f32 1.0, %v459_v42  ;;  %v429_v34 = vmul.f32 2.0, %v428_v43  ;;  %vm2717_vm10 = vmor %vm315_vm8, %vm316_vm1  ;;  %v3494_v48 = vld [vmem:[#allocation16_spill] sm:$0xff] }
 0x1be   :  { %v413_v24 = vsel %vm410_vm2, %v412_v51, %v408_v22  ;;  %v3471_v14 = vand.u32 2147483647, %v2335_v0  ;;  %v378_v33 = vsel %vm2652_vm4, %v2376_v58, %v374_v23  ;;  %vm300_vm9 = vweird.f32 %v2312_v8 }
 0x1bf   :  { %v382_v35 = vor.u32 1.1754944e-38, %v381_v5  ;;  %v351_v47 = vand.u32 2147483648, %v2325_v52  ;;  %v329_v0 = vadd.f32 %v2350_v11, %v2416_v53  ;;  %556 = vmatpush.msrb.mxu2 %v545_v59  ;;  %v544_v46 = vsub.f32 1.0, %v444_v60  ;;  %vm302_vm1 = vmor %vm300_vm9, %vm301_vm14  ;;  %v3487_v59 = vld [vmem:[#allocation11_spill] sm:$0xff] }
 0x1c0   :  { %vm395_vm6 = vcmp.eq.f32.partialorder %v3471_v14, 8.507059e+37  ;;  %v414_v58 = vmul.f32 2.0, %v413_v24  ;;  %v3474_v30 = vand.u32 2147483647, %v2331_v62  ;;  %v363_v21 = vsel %vm2669_vm12, %v2369_v55, %v359_v6  ;;  %v3489_v14 = vld [vmem:[#allocation15_spill] sm:$0xff] }
 0x1c1   :  { %v398_v50 = vsel %vm395_vm6, %v397_v1, %v393_v29  ;;  %v367_v15 = vor.u32 1.1754944e-38, %v366_v2  ;;  %v336_v53 = vand.u32 2147483648, %v2318_v13  ;;  %v314_v62 = vadd.f32 %v2345_v7, %v2419_v37  ;;  %557 = vmatpush.msrb.mxu2 %v544_v46 }
 0x1c2   :  { %vm380_vm3 = vcmp.eq.f32.partialorder %v3474_v30, 8.507059e+37  ;;  %v543_v12 = vsub.f32 1.0, %v429_v34  ;;  %v399_v26 = vmul.f32 2.0, %v398_v50  ;;  %v3477_v55 = vand.u32 2147483647, %v2328_v54  ;;  %v3488_v34 = vld [vmem:[#allocation13_spill] sm:$0xff] }
 0x1c3   :  { %v383_v39 = vsel %vm380_vm3, %v382_v35, %v378_v33  ;;  %v348_v36 = vsel %vm2685_vm5, %v2361_v49, %v344_v27  ;;  %v352_v9 = vor.u32 1.1754944e-38, %v351_v47  ;;  %v321_v37 = vand.u32 2147483648, %v2315_v10  ;;  %v3486_v27 = vld [vmem:[#allocation9_spill] sm:$0xff]  ;;  %v64_v50 = vld [vmem:[#allocation2 + $0x8] sm:$0xff]  ;;  %v3493_v35 = vld [vmem:[#allocation14_spill] sm:$0xff] }
 0x1c4   :  { %vm365_vm11 = vcmp.eq.f32.partialorder %v3477_v55, 8.507059e+37  ;;  %v299_v54 = vadd.f32 %v2340_v4, %v2408_v41  ;;  %558 = vmatpush.msrb.mxu2 %v543_v12  ;;  %v542_v31 = vsub.f32 1.0, %v414_v58  ;;  %v384_v56 = vmul.f32 2.0, %v383_v39  ;;  %v3490_v33 = vld [vmem:[#allocation17_spill] sm:$0xff]  ;;  %v3495_v47 = vld [vmem:[#allocation18_spill] sm:$0xff] }
 0x1c5   :  { %v368_v57 = vsel %vm365_vm11, %v367_v15, %v363_v21  ;;  %v3480_v49 = vand.u32 2147483647, %v2325_v52  ;;  %v333_v63 = vsel %vm2701_vm13, %v2350_v11, %v329_v0  ;;  %v337_v23 = vor.u32 1.1754944e-38, %v336_v53 }
 0x1c6   :  { %v304_v41 = vand.u32 2147483647, %v2312_v8  ;;  %v306_v42 = vand.u32 2147483648, %v2312_v8  ;;  %559 = vmatpush.msrb.mxu2 %v542_v31  ;;  %v541_v52 = vsub.f32 1.0, %v399_v26  ;;  %v369_v38 = vmul.f32 2.0, %v368_v57 }
 0x1c7   :  { %vm350_vm7 = vcmp.eq.f32.partialorder %v3480_v49, 8.507059e+37  ;;  %v3483_v22 = vand.u32 2147483647, %v2318_v13  ;;  %v318_v11 = vsel %vm2717_vm10, %v2345_v7, %v314_v62  ;;  %v322_v51 = vor.u32 1.1754944e-38, %v321_v37 }
 0x1c8   :  { %v353_v61 = vsel %vm350_vm7, %v352_v9, %v348_v36  ;;  %560 = vmatpush.msrb.mxu2 %v541_v52  ;;  %v540_v28 = vsub.f32 1.0, %v384_v56  ;;  %v3484_v6 = vand.u32 2147483647, %v2315_v10  ;;  %v303_v13 = vsel %vm302_vm1, %v2340_v4, %v299_v54  ;;  %v3485_v4 = vld [vmem:[#allocation8_spill] sm:$0xff] }
 0x1c9   :  { %vm335_vm0 = vcmp.eq.f32.partialorder %v3483_v22, 8.507059e+37  ;;  %v354_v5 = vmul.f32 2.0, %v353_v61  ;;  %v307_v60 = vor.u32 1.1754944e-38, %v306_v42  ;;  %v539_v45 = vsub.f32 1.0, %v369_v38  ;;  %v2767_v42 = vld [vmem:[#allocation2 + $0x71] ss:$0 sm:$0xff] }
 0x1ca   :  { %v338_v43 = vsel %vm335_vm0, %v337_v23, %v333_v63  ;;  %vm320_vm15 = vcmp.eq.f32.partialorder %v3484_v6, 8.507059e+37  ;;  %561 = vmatpush.msrb.mxu2 %v540_v28  ;;  %vm305_vm2 = vcmp.eq.f32.partialorder %v304_v41, 8.507059e+37  ;;  %vm3414_vm8 = vcmask 261120  }
 0x1cb   :  { %v323_v3 = vsel %vm320_vm15, %v322_v51, %v318_v11  ;;  %v339_v7 = vmul.f32 2.0, %v338_v43  ;;  %v308_v29 = vsel %vm305_vm2, %v307_v60, %v303_v13  ;;  %v538_v24 = vsub.f32 1.0, %v354_v5 }
 0x1cc   :  { %562 = vmatpush.msrb.mxu2 %v539_v45  ;;  %v324_v1 = vmul.f32 2.0, %v323_v3  ;;  %v309_v25 = vmul.f32 2.0, %v308_v29 }
 0x1cd   :  { %v537_v8 = vsub.f32 1.0, %v339_v7 }
 0x1ce   :  { %563 = vmatpush.msrb.mxu2 %v538_v24  ;;  %v536_v2 = vsub.f32 1.0, %v324_v1  ;;  %v535_v10 = vsub.f32 1.0, %v309_v25 }
 0x1d0   :  { %564 = vmatpush.msrb.mxu2 %v537_v8 }
 0x1d2   :  { %565 = vmatpush.msrb.mxu2 %v536_v2 }
 0x1d4   :  { %566 = vmatpush.msrb.mxu2 %v535_v10 }
 0x1d5   :  { %567 = vmatmul.f32.vlgmr.msrb.gmra.mxu2 %v2147_v16  ;;  %v3491_v16 = vld [vmem:[#allocation10_spill] sm:$0xff] }
 0x1dd   :  { %570 = vmatmul.f32.gmra.mxu2 %v2153_v17  ;;  %v67_v17 = vld [vmem:[#allocation2 + $0x20] sm:$0xff] }
 0x1de   :  { %678 = vmatpush.msra.mxu3 %v67_v17 }
 0x1e5   :  { %573 = vmatmul.f32.gmra.mxu2 %v2159_v18  ;;  %v66_v18 = vld [vmem:[#allocation2 + $0x18] sm:$0xff] }
 0x1e6   :  { %679 = vmatpush.msra.mxu3 %v66_v18 }
 0x1ed   :  { %576 = vmatmul.f32.gmra.mxu2 %v2165_v19  ;;  %v65_v19 = vld [vmem:[#allocation2 + $0x10] sm:$0xff] }
 0x1ee   :  { %680 = vmatpush.msra.mxu3 %v65_v19 }
 0x1f0   :  { %681 = vmatpush.msra.mxu3 %v64_v50 }
 0x1f5   :  { %579 = vmatmul.f32.gmra.mxu2 %v2171_v20  ;;  %v3492_v20 = vld [vmem:[#allocation12_spill] sm:$0xff] }
 0x1fd   :  { %582 = vmatmul.f32.gmra.mxu2 %v3485_v4 }
 0x205   :  { %585 = vmatmul.f32.gmra.mxu2 %v3486_v27 }
 0x20d   :  { %588 = vmatmul.f32.gmra.mxu2 %v3487_v59 }
 0x215   :  { %591 = vmatmul.f32.gmra.mxu2 %v3488_v34 }
 0x21d   :  { %594 = vmatmul.f32.gmra.mxu2 %v3489_v14 }
 0x225   :  { %597 = vmatmul.f32.gmra.mxu2 %v3490_v33 }
 0x22d   :  { %600 = vmatmul.f32.gmra.mxu2 %v3491_v16 }
 0x235   :  { %603 = vmatmul.f32.gmra.mxu2 %v3492_v20 }
 0x23d   :  { %606 = vmatmul.f32.gmra.mxu2 %v3493_v35 }
 0x245   :  { %609 = vmatmul.f32.gmra.mxu2 %v3494_v48 }
 0x24d   :  { %612 = vmatmul.f32.gmra.mxu2 %v3495_v47 }
 0x258   :  { %v568_v0 = vpop.f32.mrf.mxu2 }
 0x259   :  { %1809 = vmatmul.msk.f32.vlgmr.msra.gmra.mxu3 %vm3414_vm8, %v568_v0 }
 0x260   :  { %v571_v46 = vpop.f32.mrf.mxu2 }
 0x261   :  { %1810 = vmatmul.msk.f32.gmra.mxu3 %vm3414_vm8, %v571_v46 }
 0x268   :  { %v574_v58 = vpop.f32.mrf.mxu2 }
 0x269   :  { %1811 = vmatmul.msk.f32.gmra.mxu3 %vm3414_vm8, %v574_v58 }
 0x270   :  { %v577_v30 = vpop.f32.mrf.mxu2 }
 0x271   :  { %1812 = vmatmul.msk.f32.gmra.mxu3 %vm3414_vm8, %v577_v30 }
 0x278   :  { %v580_v21 = vpop.f32.mrf.mxu2 }
 0x279   :  { %1813 = vmatmul.msk.f32.gmra.mxu3 %vm3414_vm8, %v580_v21 }
 0x280   :  { %v583_v39 = vpop.f32.mrf.mxu2 }
 0x281   :  { %1814 = vmatmul.msk.f32.gmra.mxu3 %vm3414_vm8, %v583_v39 }
 0x288   :  { %v586_v15 = vpop.f32.mrf.mxu2 }
 0x289   :  { %1815 = vmatmul.msk.f32.gmra.mxu3 %vm3414_vm8, %v586_v15 }
 0x290   :  { %v589_v40 = vpop.f32.mrf.mxu2 }
 0x291   :  { %1816 = vmatmul.msk.f32.gmra.mxu3 %vm3414_vm8, %v589_v40 }
 0x298   :  { %v592_v53 = vpop.f32.mrf.mxu2 }
 0x299   :  { %1817 = vmatmul.msk.f32.gmra.mxu3 %vm3414_vm8, %v592_v53 }
 0x2a0   :  { %v595_v62 = vpop.f32.mrf.mxu2 }
 0x2a1   :  { %1818 = vmatmul.msk.f32.gmra.mxu3 %vm3414_vm8, %v595_v62 }
 0x2a8   :  { %v598_v12 = vpop.f32.mrf.mxu2 }
 0x2a9   :  { %1819 = vmatmul.msk.f32.gmra.mxu3 %vm3414_vm8, %v598_v12 }
 0x2b0   :  { %v601_v26 = vpop.f32.mrf.mxu2 }
 0x2b1   :  { %1820 = vmatmul.msk.f32.gmra.mxu3 %vm3414_vm8, %v601_v26 }
 0x2b8   :  { %v604_v55 = vpop.f32.mrf.mxu2 }
 0x2b9   :  { %1821 = vmatmul.msk.f32.gmra.mxu3 %vm3414_vm8, %v604_v55 }
 0x2c0   :  { %v607_v36 = vpop.f32.mrf.mxu2 }
 0x2c1   :  { %1822 = vmatmul.msk.f32.gmra.mxu3 %vm3414_vm8, %v607_v36 }
 0x2c8   :  { %v610_v57 = vpop.f32.mrf.mxu2 }
 0x2c9   :  { %1823 = vmatmul.msk.f32.gmra.mxu3 %vm3414_vm8, %v610_v57 }
 0x2d0   :  { %v613_v9 = vpop.f32.mrf.mxu2 }
 0x2d1   :  { %1824 = vmatmul.msk.f32.gmra.mxu3 %vm3414_vm8, %v613_v9 }
 0x2dc   :  { %v683_v44 = vpop.f32.mrf.mxu3 }
 0x2dd   :  { %v684_v38 = vadd.f32 %v2767_v42, %v683_v44 }
 0x2df   :  { %v731_v43 = vmul.f32 %v684_v38, %v684_v38 }
 0x2e1   :  { %v2775_v60 = vadd.f32 1.0, %v731_v43 }
 0x2e3   :  { %1920 = vrcp.f32 %v2775_v60 }
 0x2e4   :  { %v686_v37 = vpop.f32.mrf.mxu3 }
 0x2e5   :  { %v687_v22 = vadd.f32 %v2767_v42, %v686_v37 }
 0x2e7   :  { %v732_v51 = vmul.f32 %v687_v22, %v687_v22 }
 0x2e9   :  { %v2778_v7 = vadd.f32 1.0, %v732_v51  ;;  %v2803_v46 = vpop.eup %1920 }
 0x2ea   :  { %v764_v9 = vmul.f32 %v2803_v46, %v2775_v60 }
 0x2eb   :  { %1922 = vrcp.f32 %v2778_v7 }
 0x2ec   :  { %v689_v54 = vpop.f32.mrf.mxu3 }
 0x2ed   :  { %v690_v11 = vadd.f32 %v2767_v42, %v689_v54 }
 0x2ef   :  { %v733_v5 = vmul.f32 %v690_v11, %v690_v11 }
 0x2f1   :  { %v2781_v1 = vadd.f32 1.0, %v733_v5  ;;  %v2808_v21 = vpop.eup %1922 }
 0x2f2   :  { %v779_v54 = vmul.f32 %v2808_v21, %v2778_v7 }
 0x2f3   :  { %1924 = vrcp.f32 %v2781_v1 }
 0x2f4   :  { %v692_v31 = vpop.f32.mrf.mxu3  ;;  %v780_v38 = vsub.f32 1.0, %v779_v54 }
 0x2f5   :  { %v693_v28 = vadd.f32 %v2767_v42, %v692_v31 }
 0x2f7   :  { %v734_v29 = vmul.f32 %v693_v28, %v693_v28 }
 0x2f9   :  { %v2788_v59 = vadd.f32 1.0, %v734_v29  ;;  %v2813_v40 = vpop.eup %1924 }
 0x2fa   :  { %v794_v37 = vmul.f32 %v2813_v40, %v2781_v1 }
 0x2fb   :  { %1926 = vrcp.f32 %v2788_v59 }
 0x2fc   :  { %v695_v56 = vpop.f32.mrf.mxu3 }
 0x2fd   :  { %v696_v6 = vadd.f32 %v2767_v42, %v695_v56 }
 0x2ff   :  { %v735_v8 = vmul.f32 %v696_v6, %v696_v6 }
 0x301   :  { %v2791_v14 = vadd.f32 1.0, %v735_v8  ;;  %v2824_v55 = vpop.eup %1926 }
 0x303   :  { %1928 = vrcp.f32 %v2791_v14 }
 0x304   :  { %v698_v49 = vpop.f32.mrf.mxu3 }
 0x305   :  { %v699_v3 = vadd.f32 %v2767_v42, %v698_v49 }
 0x307   :  { %v736_v2 = vmul.f32 %v699_v3, %v699_v3 }
 0x309   :  { %v2794_v18 = vadd.f32 1.0, %v736_v2  ;;  %v2832_v44 = vpop.eup %1928 }
 0x30a   :  { %v824_v11 = vmul.f32 %v2832_v44, %v2791_v14 }
 0x30b   :  { %1930 = vrcp.f32 %v2794_v18 }
 0x30c   :  { %v701_v63 = vpop.f32.mrf.mxu3 }
 0x30d   :  { %v702_v45 = vadd.f32 %v2767_v42, %v701_v63  ;;  %v809_v63 = vmul.f32 %v2824_v55, %v2788_v59 }
 0x30f   :  { %v737_v4 = vmul.f32 %v702_v45, %v702_v45  ;;  %v810_v5 = vsub.f32 1.0, %v809_v63 }
 0x311   :  { %v2798_v35 = vadd.f32 1.0, %v737_v4  ;;  %v2839_v31 = vpop.eup %1930 }
 0x312   :  { %v839_v28 = vmul.f32 %v2839_v31, %v2794_v18 }
 0x313   :  { %1932 = vrcp.f32 %v2798_v35 }
 0x314   :  { %v704_v61 = vpop.f32.mrf.mxu3 }
 0x315   :  { %v705_v24 = vadd.f32 %v2767_v42, %v704_v61 }
 0x317   :  { %v738_v34 = vmul.f32 %v705_v24, %v705_v24 }
 0x319   :  { %v2801_v47 = vadd.f32 1.0, %v738_v34  ;;  %v2842_v49 = vpop.eup %1932 }
 0x31a   :  { %v854_v45 = vmul.f32 %v2842_v49, %v2798_v35 }
 0x31b   :  { %1934 = vrcp.f32 %v2801_v47 }
 0x31c   :  { %v707_v23 = vpop.f32.mrf.mxu3 }
 0x31d   :  { %v708_v25 = vadd.f32 %v2767_v42, %v707_v23 }
 0x31f   :  { %v739_v33 = vmul.f32 %v708_v25, %v708_v25 }
 0x321   :  { %v2806_v58 = vadd.f32 1.0, %v739_v33  ;;  %v2847_v61 = vpop.eup %1934  ;;  %v825_v33 = vsub.f32 1.0, %v824_v11 }
 0x322   :  { %v869_v25 = vmul.f32 %v2847_v61, %v2801_v47  ;;  %vm874_vm8 = vweird.f32 %v2847_v61 }
 0x323   :  { %1936 = vrcp.f32 %v2806_v58 }
 0x324   :  { %v710_v32 = vpop.f32.mrf.mxu3 }
 0x325   :  { %v711_v10 = vadd.f32 %v2767_v42, %v710_v32  ;;  %v765_v32 = vsub.f32 1.0, %v764_v9 }
 0x327   :  { %v740_v19 = vmul.f32 %v711_v10, %v711_v10  ;;  %v2871_v24 = vmul.f32 %v2803_v46, %v765_v32  ;;  %v2912_v32 = vmul.f32 %v2832_v44, %v825_v33 }
 0x329   :  { %v2811_v39 = vadd.f32 1.0, %v740_v19 }
 0x32b   :  { %1938 = vrcp.f32 %v2811_v39 }
 0x32c   :  { %v713_v41 = vpop.f32.mrf.mxu3 }
 0x32d   :  { %v714_v27 = vadd.f32 %v2767_v42, %v713_v41  ;;  %v2852_v41 = vpop.eup %1936 }
 0x32e   :  { %v884_v34 = vmul.f32 %v2852_v41, %v2806_v58 }
 0x32f   :  { %v741_v48 = vmul.f32 %v714_v27, %v714_v27 }
 0x331   :  { %v2816_v53 = vadd.f32 1.0, %v741_v48  ;;  %v2854_v22 = vpop.eup %1938 }
 0x332   :  { %v899_v19 = vmul.f32 %v2854_v22, %v2811_v39  ;;  %vm904_vm10 = vweird.f32 %v2854_v22 }
 0x333   :  { %1940 = vrcp.f32 %v2816_v53  ;;  %vm918_vm7 = vweird.f32 %v2816_v53 }
 0x334   :  { %v716_v52 = vpop.f32.mrf.mxu3  ;;  %v900_v11 = vsub.f32 1.0, %v899_v19  ;;  %v924_v19 = vand.u32 2147483648, %v2816_v53 }
 0x335   :  { %v717_v20 = vadd.f32 %v2767_v42, %v716_v52  ;;  %v795_v52 = vsub.f32 1.0, %v794_v37  ;;  %v870_v37 = vsub.f32 1.0, %v869_v25 }
 0x337   :  { %v742_v15 = vmul.f32 %v717_v20, %v717_v20  ;;  %v2879_v10 = vmul.f32 %v2813_v40, %v795_v52  ;;  %v840_v20 = vsub.f32 1.0, %v839_v28  ;;  %v2924_v33 = vmul.f32 %v2847_v61, %v870_v37 }
 0x339   :  { %v2827_v36 = vadd.f32 1.0, %v742_v15  ;;  %v2859_v43 = vpop.eup %1940 }
 0x33a   :  { %v914_v15 = vmul.f32 %v2859_v43, %v2816_v53  ;;  %vm919_vm12 = vweird.f32 %v2859_v43 }
 0x33b   :  { %vm933_vm9 = vweird.f32 %v2827_v36 }
 0x33c   :  { %v719_v13 = vpop.f32.mrf.mxu3 }
 0x33d   :  { %v720_v16 = vadd.f32 %v2767_v42, %v719_v13 }
 0x33f   :  { %v743_v30 = vmul.f32 %v720_v16, %v720_v16 }
 0x341   :  { %v2822_v12 = vadd.f32 1.0, %v743_v30 }
 0x343   :  { %vm948_vm14 = vweird.f32 %v2822_v12 }
 0x344   :  { %v722_v17 = vpop.f32.mrf.mxu3 }
 0x345   :  { %v723_v50 = vadd.f32 %v2767_v42, %v722_v17 }
 0x347   :  { %v744_v0 = vmul.f32 %v723_v50, %v723_v50  ;;  %v2894_v50 = vmul.f32 %v2824_v55, %v810_v5  ;;  %v915_v5 = vsub.f32 1.0, %v914_v15 }
 0x349   :  { %v2819_v62 = vadd.f32 1.0, %v744_v0  ;;  %v916_v6 = vmul.f32 %v2859_v43, %v915_v5 }
 0x34b   :  { %1942 = vrcp.f32 %v2819_v62  ;;  %vm963_vm3 = vweird.f32 %v2819_v62  ;;  %v969_v16 = vand.u32 2147483648, %v2819_v62 }
 0x34c   :  { %v725_v26 = vpop.f32.mrf.mxu3  ;;  %1944 = vrcp.f32 %v2822_v12 }
 0x34d   :  { %v726_v57 = vadd.f32 %v2767_v42, %v725_v26  ;;  %1946 = vrcp.f32 %v2827_v36  ;;  %v855_v26 = vsub.f32 1.0, %v854_v45 }
 0x34f   :  { %v745_v56 = vmul.f32 %v726_v57, %v726_v57  ;;  %v2919_v45 = vmul.f32 %v2842_v49, %v855_v26  ;;  %v937_v26 = vand.u32 2147483647, %v2827_v36 }
 0x351   :  { %v2850_v23 = vadd.f32 1.0, %v745_v56  ;;  %v2864_v13 = vpop.eup %1942  ;;  %v885_v56 = vsub.f32 1.0, %v884_v34  ;;  %v917_v34 = vadd.f32 %v2859_v43, %v916_v6 }
 0x352   :  { %v2873_v8 = vpop.eup %1944  ;;  %v959_v17 = vmul.f32 %v2864_v13, %v2819_v62  ;;  %vm964_vm5 = vweird.f32 %v2864_v13 }
 0x353   :  { %1948 = vrcp.f32 %v2850_v23  ;;  %v2884_v4 = vpop.eup %1946  ;;  %v944_v30 = vmul.f32 %v2873_v8, %v2822_v12  ;;  %vm949_vm11 = vweird.f32 %v2873_v8  ;;  %vm978_vm13 = vweird.f32 %v2850_v23 }
 0x354   :  { %v728_v51 = vpop.f32.mrf.mxu3  ;;  %v929_v9 = vmul.f32 %v2884_v4, %v2827_v36  ;;  %vm934_vm4 = vweird.f32 %v2884_v4  ;;  %v982_v5 = vand.u32 2147483647, %v2850_v23 }
 0x355   :  { %v729_v3 = vadd.f32 %v2767_v42, %v728_v51  ;;  %v2882_v42 = vmul.f32 %v2808_v21, %v780_v38  ;;  %v960_v38 = vsub.f32 1.0, %v959_v17  ;;  %v2915_v51 = vmul.f32 %v2839_v31, %v840_v20 }
 0x356   :  { %v945_v28 = vsub.f32 1.0, %v944_v30  ;;  %v922_v17 = vand.u32 2147483647, %v2816_v53  ;;  %v907_v20 = vand.u32 2147483647, %v2811_v39  ;;  %v2930_v30 = vmul.f32 %v2852_v41, %v885_v56 }
 0x357   :  { %v746_v27 = vmul.f32 %v729_v3, %v729_v3  ;;  %v961_v15 = vmul.f32 %v2864_v13, %v960_v38  ;;  %v879_v53 = vand.u32 2147483648, %v2801_v47 }
 0x358   :  { %v946_v37 = vmul.f32 %v2873_v8, %v945_v28 }
 0x359   :  { %v2896_v48 = vpop.eup %1948  ;;  %v2898_v0 = vadd.f32 1.0, %v746_v27  ;;  %v930_v27 = vsub.f32 1.0, %v929_v9  ;;  %v901_v9 = vmul.f32 %v2854_v22, %v900_v11  ;;  %v984_v11 = vand.u32 2147483648, %v2850_v23 }
 0x35a   :  { %v974_v57 = vmul.f32 %v2896_v48, %v2850_v23  ;;  %vm979_vm6 = vweird.f32 %v2896_v48  ;;  %v947_v23 = vadd.f32 %v2873_v8, %v946_v37  ;;  %v952_v37 = vand.u32 2147483647, %v2822_v12 }
 0x35b   :  { %1950 = vrcp.f32 %v2898_v0  ;;  %v931_v38 = vmul.f32 %v2884_v4, %v930_v27  ;;  %v999_v27 = vand.u32 2147483648, %v2898_v0  ;;  %vm2958_vm0 = vmor %vm978_vm13, %vm979_vm6  ;;  %v985_v3 = vor.u32 1.1754944e-38, %v984_v11 }
 0x35c   :  { %v975_v52 = vsub.f32 1.0, %v974_v57  ;;  %v939_v57 = vand.u32 2147483648, %v2827_v36  ;;  %vm2975_vm6 = vmor %vm963_vm3, %vm964_vm5  ;;  %vm993_vm13 = vweird.f32 %v2898_v0  ;;  %vm888_vm5 = vweird.f32 %v2806_v58 }
 0x35d   :  { %v932_v2 = vadd.f32 %v2884_v4, %v931_v38  ;;  %vm2990_vm3 = vmor %vm948_vm14, %vm949_vm11  ;;  %v970_v38 = vor.u32 1.1754944e-38, %v969_v16  ;;  %vm873_vm14 = vweird.f32 %v2801_v47  ;;  %vm859_vm11 = vweird.f32 %v2842_v49 }
 0x35e   :  { %v976_v25 = vmul.f32 %v2896_v48, %v975_v52  ;;  %v902_v16 = vadd.f32 %v2854_v22, %v901_v9  ;;  %v894_v36 = vand.u32 2147483648, %v2806_v58  ;;  %v3520_v9 = vand.u32 2147483647, %v2798_v35 }
 0x360   :  { %v977_v29 = vadd.f32 %v2896_v48, %v976_v25  ;;  %v962_v25 = vadd.f32 %v2864_v13, %v961_v15  ;;  %v997_v15 = vand.u32 2147483647, %v2898_v0 }
 0x361   :  { %v1951_v52 = vpop.eup %1950 }
 0x362   :  { %v989_v56 = vmul.f32 %v1951_v52, %v2898_v0  ;;  %vm994_vm1 = vweird.f32 %v1951_v52  ;;  %v981_v63 = vsel %vm2958_vm0, %v2896_v48, %v977_v29  ;;  %vm983_vm0 = vcmp.eq.f32.partialorder %v982_v5, 8.507059e+37 }
 0x363   :  { %v966_v48 = vsel %vm2975_vm6, %v2864_v13, %v962_v25  ;;  %vm995_vm2 = vmor %vm993_vm13, %vm994_vm1  ;;  %v1000_v0 = vor.u32 1.1754944e-38, %v999_v27  ;;  %vm998_vm6 = vcmp.eq.f32.partialorder %v997_v15, 8.507059e+37  ;;  %vm844_vm13 = vweird.f32 %v2839_v31 }
 0x364   :  { %v990_v28 = vsub.f32 1.0, %v989_v56  ;;  %v967_v56 = vand.u32 2147483647, %v2819_v62  ;;  %vm3007_vm1 = vmor %vm933_vm9, %vm934_vm4  ;;  %v940_v27 = vor.u32 1.1754944e-38, %v939_v57  ;;  %vm938_vm9 = vcmp.eq.f32.partialorder %v937_v26, 8.507059e+37 }
 0x365   :  { %vm3023_vm4 = vmor %vm918_vm7, %vm919_vm12  ;;  %vm829_vm12 = vweird.f32 %v2832_v44  ;;  %vm3506_vm7 = vweird.f32 %v2811_v39 }
 0x366   :  { %v991_v54 = vmul.f32 %v1951_v52, %v990_v28  ;;  %v954_v28 = vand.u32 2147483648, %v2822_v12  ;;  %vm968_vm15 = vcmp.eq.f32.partialorder %v967_v56, 8.507059e+37  ;;  %v951_v12 = vsel %vm2990_vm3, %v2873_v8, %v947_v23  ;;  %vm3043_vm3 = vmor %vm3506_vm7, %vm904_vm10 }
 0x367   :  { %v971_v5 = vsel %vm968_vm15, %v970_v38, %v966_v48  ;;  %v936_v8 = vsel %vm3007_vm1, %v2884_v4, %v932_v2  ;;  %vm858_vm15 = vweird.f32 %v2798_v35  ;;  %v909_v56 = vand.u32 2147483648, %v2811_v39 }
 0x368   :  { %v992_v29 = vadd.f32 %v1951_v52, %v991_v54  ;;  %v986_v54 = vsel %vm983_vm0, %v985_v3, %v981_v63  ;;  %v955_v25 = vor.u32 1.1754944e-38, %v954_v28  ;;  %v887_v4 = vadd.f32 %v2852_v41, %v2930_v30 }
 0x369   :  { %v987_v3 = vmul.f32 2.0, %v986_v54  ;;  %v972_v15 = vmul.f32 2.0, %v971_v5  ;;  %v921_v57 = vsel %vm3023_vm4, %v2859_v43, %v917_v34  ;;  %vm843_vm0 = vweird.f32 %v2794_v18 }
 0x36a   :  { %v996_v13 = vsel %vm995_vm2, %v1951_v52, %v992_v29  ;;  %vm953_vm2 = vcmp.eq.f32.partialorder %v952_v37, 8.507059e+37  ;;  %v941_v37 = vsel %vm938_vm9, %v940_v27, %v936_v8  ;;  %v925_v28 = vor.u32 1.1754944e-38, %v924_v19 }
 0x36b   :  { %v1001_v11 = vsel %vm998_vm6, %v1000_v0, %v996_v13  ;;  %v956_v52 = vsel %vm953_vm2, %v955_v25, %v951_v12  ;;  %v872_v43 = vadd.f32 %v2847_v61, %v2924_v33  ;;  %v1017_v26 = vsub.f32 1.0, %v987_v3 }
 0x36c   :  { %v1002_v63 = vmul.f32 2.0, %v1001_v11  ;;  %v957_v2 = vmul.f32 2.0, %v956_v52  ;;  %vm923_vm6 = vcmp.eq.f32.partialorder %v922_v17, 8.507059e+37  ;;  %v906_v19 = vsel %vm3043_vm3, %v2854_v22, %v902_v16  ;;  %vm3079_vm3 = vmor %vm873_vm14, %vm874_vm8 }
 0x36d   :  { %vm828_vm10 = vweird.f32 %v2791_v14  ;;  %vm814_vm1 = vweird.f32 %v2824_v55  ;;  %v926_v29 = vsel %vm923_vm6, %v925_v28, %v921_v57  ;;  %v910_v48 = vor.u32 1.1754944e-38, %v909_v56 }
 0x36e   :  { %v1018_v23 = vsub.f32 1.0, %v1002_v63  ;;  %vm3509_vm2 = vweird.f32 %v2852_v41  ;;  %v857_v17 = vadd.f32 %v2842_v49, %v2919_v45  ;;  %v1016_v22 = vsub.f32 1.0, %v972_v15 }
 0x36f   :  { %vm3061_vm4 = vmor %vm888_vm5, %vm3509_vm2  ;;  %v942_v62 = vmul.f32 2.0, %v941_v37  ;;  %vm908_vm9 = vcmp.eq.f32.partialorder %v907_v20, 8.507059e+37  ;;  %vm813_vm5 = vweird.f32 %v2788_v59  ;;  %vm799_vm7 = vweird.f32 %v2813_v40 }
 0x370   :  { %1019 = vmatpush.msrb.mxu1 %v1018_v23  ;;  %v891_v0 = vsel %vm3061_vm4, %v2852_v41, %v887_v4  ;;  %v911_v54 = vsel %vm908_vm9, %v910_v48, %v906_v19  ;;  %v895_v38 = vor.u32 1.1754944e-38, %v894_v36  ;;  %v864_v39 = vand.u32 2147483648, %v2798_v35  ;;  %vm3097_vm2 = vmor %vm858_vm15, %vm859_vm11 }
 0x371   :  { %v842_v20 = vadd.f32 %v2839_v31, %v2915_v51  ;;  %v1015_v41 = vsub.f32 1.0, %v957_v2  ;;  %v927_v34 = vmul.f32 2.0, %v926_v29  ;;  %v3514_v13 = vand.u32 2147483647, %v2806_v58  ;;  %vm3115_vm9 = vmor %vm843_vm0, %vm844_vm13 }
 0x372   :  { %1020 = vmatpush.msrb.mxu1 %v1017_v26  ;;  %v876_v12 = vsel %vm3079_vm3, %v2847_v61, %v872_v43  ;;  %vm798_vm8 = vweird.f32 %v2781_v1  ;;  %vm784_vm14 = vweird.f32 %v2808_v21  ;;  %v880_v5 = vor.u32 1.1754944e-38, %v879_v53  ;;  %vm3132_vm0 = vmor %vm828_vm10, %vm829_vm12 }
 0x373   :  { %vm893_vm6 = vcmp.eq.f32.partialorder %v3514_v13, 8.507059e+37  ;;  %v849_v58 = vand.u32 2147483648, %v2794_v18  ;;  %v827_v25 = vadd.f32 %v2832_v44, %v2912_v32  ;;  %v1014_v61 = vsub.f32 1.0, %v942_v62  ;;  %vm3148_vm12 = vmor %vm813_vm5, %vm814_vm1  ;;  %v1988_v32 = vld [vmem:[%s3382_s0 + $0x20] sm:$0xff] }
 0x374   :  { %1021 = vmatpush.msrb.mxu1 %v1016_v22  ;;  %v896_v11 = vsel %vm893_vm6, %v895_v38, %v891_v0  ;;  %v912_v6 = vmul.f32 2.0, %v911_v54  ;;  %v3517_v16 = vand.u32 2147483647, %v2801_v47  ;;  %v861_v63 = vsel %vm3097_vm2, %v2842_v49, %v857_v17  ;;  %vm3164_vm1 = vmor %vm798_vm8, %vm799_vm7  ;;  %v3262_v54 = vld [vmem:[#allocation2 + $0x72] ss:$0 sm:$0xff] }
 0x375   :  { %vm783_vm11 = vweird.f32 %v2778_v7  ;;  %vm769_vm15 = vweird.f32 %v2803_v46  ;;  %v865_v8 = vor.u32 1.1754944e-38, %v864_v39  ;;  %v834_v47 = vand.u32 2147483648, %v2791_v14 }
 0x376   :  { %1022 = vmatpush.msrb.mxu1 %v1015_v41  ;;  %vm878_vm4 = vcmp.eq.f32.partialorder %v3517_v16, 8.507059e+37  ;;  %v812_v52 = vadd.f32 %v2824_v55, %v2894_v50  ;;  %v1013_v49 = vsub.f32 1.0, %v927_v34  ;;  %v897_v27 = vmul.f32 2.0, %v896_v11  ;;  %vm3180_vm7 = vmor %vm783_vm11, %vm784_vm14  ;;  %v70_v50 = vld [vmem:[#allocation2 + $0x38] sm:$0xff] }
 0x377   :  { %v881_v3 = vsel %vm878_vm4, %v880_v5, %v876_v12  ;;  %vm863_vm3 = vcmp.eq.f32.partialorder %v3520_v9, 8.507059e+37  ;;  %v846_v56 = vsel %vm3115_vm9, %v2839_v31, %v842_v20  ;;  %vm768_vm13 = vweird.f32 %v2775_v60  ;;  %v1992_v9 = vld [vmem:[%s3382_s0 + $0x40] sm:$0xff] }
 0x378   :  { %1023 = vmatpush.msrb.mxu1 %v1014_v61  ;;  %v866_v4 = vsel %vm863_vm3, %v865_v8, %v861_v63  ;;  %v850_v23 = vor.u32 1.1754944e-38, %v849_v58  ;;  %v819_v15 = vand.u32 2147483648, %v2788_v59  ;;  %v797_v35 = vadd.f32 %v2813_v40, %v2879_v10  ;;  %vm770_vm14 = vmor %vm768_vm13, %vm769_vm15  ;;  %v1985_v63 = vld [vmem:[%s3382_s0 + $0x8] sm:$0xff]  ;;  %v1987_v8 = vld [vmem:[%s3382_s0 + $0x18] sm:$0xff] }
 0x379   :  { %v1012_v57 = vsub.f32 1.0, %v912_v6  ;;  %v882_v31 = vmul.f32 2.0, %v881_v3  ;;  %v3523_v37 = vand.u32 2147483647, %v2794_v18  ;;  %v831_v28 = vsel %vm3132_vm0, %v2832_v44, %v827_v25  ;;  %v1986_v3 = vld [vmem:[%s3382_s0 + $0x10] sm:$0xff] }
 0x37a   :  { %1024 = vmatpush.msrb.mxu1 %v1013_v49  ;;  %v835_v36 = vor.u32 1.1754944e-38, %v834_v47  ;;  %v804_v10 = vand.u32 2147483648, %v2781_v1  ;;  %v782_v18 = vadd.f32 %v2808_v21, %v2882_v42  ;;  %v1011_v26 = vsub.f32 1.0, %v897_v27  ;;  %v1989_v47 = vld [vmem:[%s3382_s0 + $0x28] sm:$0xff]  ;;  %v1991_v49 = vld [vmem:[%s3382_s0 + $0x38] sm:$0xff]  ;;  %v71_v27 = vld [vmem:[#allocation2 + $0x40] sm:$0xff] }
 0x37b   :  { %vm848_vm6 = vcmp.eq.f32.partialorder %v3523_v37, 8.507059e+37  ;;  %v867_v2 = vmul.f32 2.0, %v866_v4  ;;  %v3526_v44 = vand.u32 2147483647, %v2791_v14  ;;  %v816_v19 = vsel %vm3148_vm12, %v2824_v55, %v812_v52  ;;  %v1990_v52 = vld [vmem:[%s3382_s0 + $0x30] sm:$0xff]  ;;  %1145 = vmatpush.msrb.mxu3 %v71_v27 }
 0x37c   :  { %v851_v30 = vsel %vm848_vm6, %v850_v23, %v846_v56  ;;  %1025 = vmatpush.msrb.mxu1 %v1012_v57  ;;  %v820_v48 = vor.u32 1.1754944e-38, %v819_v15  ;;  %v789_v42 = vand.u32 2147483648, %v2778_v7  ;;  %v767_v14 = vadd.f32 %v2803_v46, %v2871_v24  ;;  %v1993_v56 = vld [vmem:[%s3382_s0 + $0x48] sm:$0xff]  ;;  %v1994_v4 = vld [vmem:[%s3382_s0 + $0x50] sm:$0xff]  ;;  %v1995_v23 = vld [vmem:[%s3382_s0 + $0x58] sm:$0xff] }
 0x37d   :  { %vm833_vm10 = vcmp.eq.f32.partialorder %v3526_v44, 8.507059e+37  ;;  %v1010_v53 = vsub.f32 1.0, %v882_v31  ;;  %v852_v17 = vmul.f32 2.0, %v851_v30  ;;  %v3529_v55 = vand.u32 2147483647, %v2788_v59  ;;  %v69_v15 = vld [vmem:[#allocation2 + $0x30] sm:$0xff]  ;;  %1146 = vmatpush.msrb.mxu3 %v70_v50 }
 0x37e   :  { %v836_v29 = vsel %vm833_vm10, %v835_v36, %v831_v28  ;;  %1026 = vmatpush.msrb.mxu1 %v1011_v26  ;;  %v801_v22 = vsel %vm3164_vm1, %v2813_v40, %v797_v35  ;;  %v805_v0 = vor.u32 1.1754944e-38, %v804_v10  ;;  %v772_v24 = vand.u32 2147483647, %v2775_v60  ;;  %v68_v35 = vld [vmem:[#allocation2 + $0x28] sm:$0xff]  ;;  %v1996_v57 = vld [vmem:[%s3382_s0 + $0x60] sm:$0xff]  ;;  %v1998_v37 = vld [vmem:[%s3382_s0 + $0x70] sm:$0xff] }
 0x37f   :  { %vm818_vm5 = vcmp.eq.f32.partialorder %v3529_v55, 8.507059e+37  ;;  %v774_v38 = vand.u32 2147483648, %v2775_v60  ;;  %v1009_v59 = vsub.f32 1.0, %v867_v2  ;;  %v837_v45 = vmul.f32 2.0, %v836_v29  ;;  %1147 = vmatpush.msrb.mxu3 %v69_v15  ;;  %v1997_v31 = vld [vmem:[%s3382_s0 + $0x68] sm:$0xff]  ;;  %v1999_v28 = vld [vmem:[%s3382_s0 + $0x78] sm:$0xff] }
 0x380   :  { %v821_v62 = vsel %vm818_vm5, %v820_v48, %v816_v19  ;;  %1027 = vmatpush.msrb.mxu1 %v1010_v53  ;;  %v3532_v39 = vand.u32 2147483647, %v2781_v1  ;;  %v786_v40 = vsel %vm3180_vm7, %v2808_v21, %v782_v18  ;;  %v790_v41 = vor.u32 1.1754944e-38, %v789_v42  ;;  %v75_v55 = vld [vmem:[#allocation2 + $0x60] sm:$0xff] }
 0x381   :  { %v1008_v34 = vsub.f32 1.0, %v852_v17  ;;  %v822_v13 = vmul.f32 2.0, %v821_v62  ;;  %v3533_v12 = vand.u32 2147483647, %v2778_v7  ;;  %v771_v1 = vsel %vm770_vm14, %v2803_v46, %v767_v14  ;;  %v1984_v46 = vld [vmem:[%s3382_s0] sm:$0xff]  ;;  %1148 = vmatpush.msrb.mxu3 %v68_v35  ;;  %1546 = vmatpush.msrb.mxu0 %v75_v55  ;;  %v73_v62 = vld [vmem:[#allocation2 + $0x50] sm:$0xff] }
 0x382   :  { %vm803_vm8 = vcmp.eq.f32.partialorder %v3532_v39, 8.507059e+37  ;;  %1028 = vmatpush.msrb.mxu1 %v1009_v59  ;;  %v775_v5 = vor.u32 1.1754944e-38, %v774_v38  ;;  %v1007_v51 = vsub.f32 1.0, %v837_v45  ;;  %vm773_vm4 = vcmp.eq.f32.partialorder %v772_v24, 8.507059e+37 }
 0x383   :  { %v806_v20 = vsel %vm803_vm8, %v805_v0, %v801_v22  ;;  %vm788_vm2 = vcmp.eq.f32.partialorder %v3533_v12, 8.507059e+37  ;;  %v1006_v25 = vsub.f32 1.0, %v822_v13  ;;  %vm3534_vm11 = vcmask 261120   ;;  %v74_v22 = vld [vmem:[#allocation2 + $0x58] sm:$0xff]  ;;  %v72_v0 = vld [vmem:[#allocation2 + $0x48] sm:$0xff] }
 0x384   :  { %v791_v11 = vsel %vm788_vm2, %v790_v41, %v786_v40  ;;  %1029 = vmatpush.msrb.mxu1 %v1008_v34  ;;  %v807_v21 = vmul.f32 2.0, %v806_v20  ;;  %v776_v58 = vsel %vm773_vm4, %v775_v5, %v771_v1  ;;  %vm3535_vm15 = vmmov %vm3534_vm11  ;;  %1547 = vmatpush.msrb.mxu0 %v74_v22 }
 0x385   :  { %v792_v61 = vmul.f32 2.0, %v791_v11  ;;  %v777_v6 = vmul.f32 2.0, %v776_v58  ;;  %vm3536_vm9 = vmmov %vm3534_vm11 }
 0x386   :  { %1030 = vmatpush.msrb.mxu1 %v1007_v51  ;;  %v1005_v60 = vsub.f32 1.0, %v807_v21  ;;  %vm3537_vm3 = vmmov %vm3536_vm9  ;;  %1548 = vmatpush.msrb.mxu0 %v73_v62 }
 0x387   :  { %v1004_v16 = vsub.f32 1.0, %v792_v61  ;;  %v1003_v7 = vsub.f32 1.0, %v777_v6  ;;  %vm3538_vm13 = vmmov %vm3537_vm3 }
 0x388   :  { %1031 = vmatpush.msrb.mxu1 %v1006_v25  ;;  %vm3539_vm0 = vmmov %vm3537_vm3  ;;  %1549 = vmatpush.msrb.mxu0 %v72_v0 }
 0x389   :  { %vm3540_vm6 = vmmov %vm3539_vm0 }
 0x38a   :  { %1032 = vmatpush.msrb.mxu1 %v1005_v60  ;;  %vm3541_vm12 = vmmov %vm3539_vm0 }
 0x38b   :  { %vm3542_vm10 = vmmov %vm3539_vm0 }
 0x38c   :  { %1033 = vmatpush.msrb.mxu1 %v1004_v16  ;;  %vm3543_vm1 = vmmov %vm3539_vm0 }
 0x38d   :  { %vm3544_vm5 = vmmov %vm3539_vm0 }
 0x38e   :  { %1034 = vmatpush.msrb.mxu1 %v1003_v7  ;;  %vm3545_vm7 = vmmov %vm3539_vm0 }
 0x38f   :  { %1035 = vmatmul.f32.vlgmr.msrb.gmra.mxu1 %v1984_v46  ;;  %vm3546_vm8 = vmmov %vm3539_vm0 }
 0x390   :  { %vm3547_vm14 = vmmov %vm3539_vm0 }
 0x391   :  { %vm3548_vm2 = vmmov %vm3539_vm0 }
 0x392   :  { %vm3549_vm4 = vmmov %vm3539_vm0 }
 0x397   :  { %1038 = vmatmul.f32.gmra.mxu1 %v1985_v63 }
 0x39f   :  { %1041 = vmatmul.f32.gmra.mxu1 %v1986_v3 }
 0x3a7   :  { %1044 = vmatmul.f32.gmra.mxu1 %v1987_v8 }
 0x3af   :  { %1047 = vmatmul.f32.gmra.mxu1 %v1988_v32 }
 0x3b7   :  { %1050 = vmatmul.f32.gmra.mxu1 %v1989_v47 }
 0x3bf   :  { %1053 = vmatmul.f32.gmra.mxu1 %v1990_v52 }
 0x3c7   :  { %1056 = vmatmul.f32.gmra.mxu1 %v1991_v49 }
 0x3cf   :  { %1059 = vmatmul.f32.gmra.mxu1 %v1992_v9 }
 0x3d7   :  { %1062 = vmatmul.f32.gmra.mxu1 %v1993_v56 }
 0x3df   :  { %1065 = vmatmul.f32.gmra.mxu1 %v1994_v4 }
 0x3e7   :  { %1068 = vmatmul.f32.gmra.mxu1 %v1995_v23 }
 0x3ef   :  { %1071 = vmatmul.f32.gmra.mxu1 %v1996_v57 }
 0x3f7   :  { %1074 = vmatmul.f32.gmra.mxu1 %v1997_v31 }
 0x3ff   :  { %1077 = vmatmul.f32.gmra.mxu1 %v1998_v37 }
 0x407   :  { %1080 = vmatmul.f32.gmra.mxu1 %v1999_v28 }
 0x40c   :  { %v1036_v30 = vpop.f32.mrf.mxu1 }
 0x40d   :  { %1825 = vmatmul.msk.f32.vlgmr.msrb.gmra.mxu3 %vm3534_vm11, %v1036_v30 }
 0x414   :  { %v1039_v36 = vpop.f32.mrf.mxu1 }
 0x415   :  { %1826 = vmatmul.msk.f32.gmra.mxu3 %vm3535_vm15, %v1039_v36 }
 0x41c   :  { %v1042_v43 = vpop.f32.mrf.mxu1 }
 0x41d   :  { %1827 = vmatmul.msk.f32.gmra.mxu3 %vm3536_vm9, %v1042_v43 }
 0x424   :  { %v1045_v10 = vpop.f32.mrf.mxu1 }
 0x425   :  { %1828 = vmatmul.msk.f32.gmra.mxu3 %vm3537_vm3, %v1045_v10 }
 0x42c   :  { %v1048_v18 = vpop.f32.mrf.mxu1 }
 0x42d   :  { %1829 = vmatmul.msk.f32.gmra.mxu3 %vm3538_vm13, %v1048_v18 }
 0x434   :  { %v1051_v26 = vpop.f32.mrf.mxu1 }
 0x435   :  { %1830 = vmatmul.msk.f32.gmra.mxu3 %vm3539_vm0, %v1051_v26 }
 0x43c   :  { %v1054_v2 = vpop.f32.mrf.mxu1 }
 0x43d   :  { %1831 = vmatmul.msk.f32.gmra.mxu3 %vm3540_vm6, %v1054_v2 }
 0x444   :  { %v1057_v44 = vpop.f32.mrf.mxu1 }
 0x445   :  { %1832 = vmatmul.msk.f32.gmra.mxu3 %vm3541_vm12, %v1057_v44 }
 0x44c   :  { %v1060_v19 = vpop.f32.mrf.mxu1 }
 0x44d   :  { %1833 = vmatmul.msk.f32.gmra.mxu3 %vm3542_vm10, %v1060_v19 }
 0x454   :  { %v1063_v29 = vpop.f32.mrf.mxu1 }
 0x455   :  { %1834 = vmatmul.msk.f32.gmra.mxu3 %vm3543_vm1, %v1063_v29 }
 0x45c   :  { %v1066_v48 = vpop.f32.mrf.mxu1 }
 0x45d   :  { %1835 = vmatmul.msk.f32.gmra.mxu3 %vm3544_vm5, %v1066_v48  ;;  %vm3550_vm5 = vmmov %vm3539_vm0 }
 0x464   :  { %v1069_v33 = vpop.f32.mrf.mxu1 }
 0x465   :  { %1836 = vmatmul.msk.f32.gmra.mxu3 %vm3545_vm7, %v1069_v33 }
 0x46c   :  { %v1072_v42 = vpop.f32.mrf.mxu1 }
 0x46d   :  { %1837 = vmatmul.msk.f32.gmra.mxu3 %vm3546_vm8, %v1072_v42 }
 0x474   :  { %v1075_v14 = vpop.f32.mrf.mxu1 }
 0x475   :  { %1838 = vmatmul.msk.f32.gmra.mxu3 %vm3547_vm14, %v1075_v14 }
 0x47c   :  { %v1078_v53 = vpop.f32.mrf.mxu1 }
 0x47d   :  { %1839 = vmatmul.msk.f32.gmra.mxu3 %vm3548_vm2, %v1078_v53 }
 0x484   :  { %v1081_v17 = vpop.f32.mrf.mxu1 }
 0x485   :  { %1840 = vmatmul.msk.f32.gmra.mxu3 %vm3549_vm4, %v1081_v17  ;;  %vm3551_vm4 = vmmov %vm3539_vm0 }
 0x490   :  { %v1150_v24 = vpop.f32.mrf.mxu3 }
 0x491   :  { %v1151_v38 = vadd.f32 %v3262_v54, %v1150_v24 }
 0x493   :  { %v1198_v59 = vmul.f32 %v1151_v38, %v1151_v38 }
 0x495   :  { %v1214_v45 = vadd.f32 1.0, %v1198_v59 }
 0x497   :  { %1952 = vrcp.f32 %v1214_v45  ;;  %v1241_v5 = vand.u32 2147483648, %v1214_v45  ;;  %v1239_v21 = vand.u32 2147483647, %v1214_v45  ;;  %vm1235_vm15 = vweird.f32 %v1214_v45 }
 0x498   :  { %v1153_v39 = vpop.f32.mrf.mxu3 }
 0x499   :  { %v1154_v40 = vadd.f32 %v3262_v54, %v1153_v39  ;;  %v1242_v6 = vor.u32 1.1754944e-38, %v1241_v5  ;;  %vm1240_vm3 = vcmp.eq.f32.partialorder %v1239_v21, 8.507059e+37 }
 0x49b   :  { %v1199_v20 = vmul.f32 %v1154_v40, %v1154_v40 }
 0x49d   :  { %v1953_v41 = vpop.eup %1952  ;;  %v1215_v34 = vadd.f32 1.0, %v1199_v20 }
 0x49e   :  { %v1231_v13 = vmul.f32 %v1953_v41, %v1214_v45  ;;  %vm1236_vm11 = vweird.f32 %v1953_v41 }
 0x49f   :  { %1954 = vrcp.f32 %v1215_v34  ;;  %vm1237_vm9 = vmor %vm1235_vm15, %vm1236_vm11  ;;  %v1256_v47 = vand.u32 2147483648, %v1215_v34  ;;  %v1254_v27 = vand.u32 2147483647, %v1215_v34  ;;  %vm1250_vm6 = vweird.f32 %v1215_v34 }
 0x4a0   :  { %v1232_v12 = vsub.f32 1.0, %v1231_v13  ;;  %v1156_v1 = vpop.f32.mrf.mxu3 }
 0x4a1   :  { %v1157_v11 = vadd.f32 %v3262_v54, %v1156_v1  ;;  %v1257_v50 = vor.u32 1.1754944e-38, %v1256_v47  ;;  %vm1255_vm10 = vcmp.eq.f32.partialorder %v1254_v27, 8.507059e+37 }
 0x4a2   :  { %v1233_v51 = vmul.f32 %v1953_v41, %v1232_v12 }
 0x4a3   :  { %v1200_v58 = vmul.f32 %v1157_v11, %v1157_v11 }
 0x4a4   :  { %v1234_v25 = vadd.f32 %v1953_v41, %v1233_v51 }
 0x4a5   :  { %v1955_v61 = vpop.eup %1954  ;;  %v1216_v60 = vadd.f32 1.0, %v1200_v58 }
 0x4a6   :  { %v1246_v16 = vmul.f32 %v1955_v61, %v1215_v34  ;;  %v1238_v7 = vsel %vm1237_vm9, %v1953_v41, %v1234_v25  ;;  %vm1251_vm13 = vweird.f32 %v1955_v61 }
 0x4a7   :  { %1956 = vrcp.f32 %v1216_v60  ;;  %v1243_v46 = vsel %vm1240_vm3, %v1242_v6, %v1238_v7  ;;  %vm1252_vm12 = vmor %vm1250_vm6, %vm1251_vm13  ;;  %v1271_v36 = vand.u32 2147483648, %v1216_v60  ;;  %v1269_v18 = vand.u32 2147483647, %v1216_v60 }
 0x4a8   :  { %v1247_v63 = vsub.f32 1.0, %v1246_v16  ;;  %v1159_v3 = vpop.f32.mrf.mxu3  ;;  %v1244_v8 = vmul.f32 2.0, %v1243_v46  ;;  %vm1265_vm7 = vweird.f32 %v1216_v60  ;;  %vm3552_vm13 = vmmov %vm3539_vm0 }
 0x4a9   :  { %v1160_v32 = vadd.f32 %v3262_v54, %v1159_v3  ;;  %v1272_v29 = vor.u32 1.1754944e-38, %v1271_v36  ;;  %vm1270_vm14 = vcmp.eq.f32.partialorder %v1269_v18, 8.507059e+37 }
 0x4aa   :  { %v1470_v52 = vsub.f32 1.0, %v1244_v8  ;;  %v1248_v49 = vmul.f32 %v1955_v61, %v1247_v63 }
 0x4ab   :  { %v1201_v9 = vmul.f32 %v1160_v32, %v1160_v32 }
 0x4ac   :  { %1841 = vmatmul.msk.f32.vlgmr.msrb.gmra.mxu0 %vm3539_vm0, %v1470_v52  ;;  %v1249_v56 = vadd.f32 %v1955_v61, %v1248_v49 }
 0x4ad   :  { %v1957_v4 = vpop.eup %1956  ;;  %v1217_v23 = vadd.f32 1.0, %v1201_v9 }
 0x4ae   :  { %v1261_v15 = vmul.f32 %v1957_v4, %v1216_v60  ;;  %v1253_v35 = vsel %vm1252_vm12, %v1955_v61, %v1249_v56  ;;  %vm1266_vm1 = vweird.f32 %v1957_v4 }
 0x4af   :  { %1958 = vrcp.f32 %v1217_v23  ;;  %v1258_v57 = vsel %vm1255_vm10, %v1257_v50, %v1253_v35  ;;  %vm1267_vm8 = vmor %vm1265_vm7, %vm1266_vm1  ;;  %v1286_v22 = vand.u32 2147483648, %v1217_v23  ;;  %v1284_v24 = vand.u32 2147483647, %v1217_v23 }
 0x4b0   :  { %v1262_v31 = vsub.f32 1.0, %v1261_v15  ;;  %v1162_v37 = vpop.f32.mrf.mxu3  ;;  %v1259_v28 = vmul.f32 2.0, %v1258_v57  ;;  %vm1280_vm11 = vweird.f32 %v1217_v23  ;;  %vm3553_vm1 = vmmov %vm3551_vm4 }
 0x4b1   :  { %v1163_v30 = vadd.f32 %v3262_v54, %v1162_v37  ;;  %v1287_v40 = vor.u32 1.1754944e-38, %v1286_v22  ;;  %vm1285_vm9 = vcmp.eq.f32.partialorder %v1284_v24, 8.507059e+37 }
 0x4b2   :  { %v1471_v43 = vsub.f32 1.0, %v1259_v28  ;;  %v1263_v10 = vmul.f32 %v1957_v4, %v1262_v31 }
 0x4b3   :  { %v1202_v26 = vmul.f32 %v1163_v30, %v1163_v30 }
 0x4b4   :  { %1842 = vmatmul.msk.f32.gmra.mxu0 %vm3550_vm5, %v1471_v43  ;;  %v1264_v2 = vadd.f32 %v1957_v4, %v1263_v10 }
 0x4b5   :  { %v1959_v44 = vpop.eup %1958  ;;  %v1218_v19 = vadd.f32 1.0, %v1202_v26 }
 0x4b6   :  { %v1276_v48 = vmul.f32 %v1959_v44, %v1217_v23  ;;  %v1268_v33 = vsel %vm1267_vm8, %v1957_v4, %v1264_v2  ;;  %vm1281_vm2 = vweird.f32 %v1959_v44 }
 0x4b7   :  { %1960 = vrcp.f32 %v1218_v19  ;;  %v1273_v42 = vsel %vm1270_vm14, %v1272_v29, %v1268_v33  ;;  %vm1282_vm15 = vmor %vm1280_vm11, %vm1281_vm2  ;;  %v1301_v5 = vand.u32 2147483648, %v1218_v19  ;;  %v1299_v58 = vand.u32 2147483647, %v1218_v19 }
 0x4b8   :  { %v1277_v14 = vsub.f32 1.0, %v1276_v48  ;;  %v1165_v53 = vpop.f32.mrf.mxu3  ;;  %v1274_v17 = vmul.f32 2.0, %v1273_v42  ;;  %vm1295_vm0 = vweird.f32 %v1218_v19  ;;  %vm3554_vm2 = vmmov %vm3553_vm1 }
 0x4b9   :  { %v1166_v55 = vadd.f32 %v3262_v54, %v1165_v53  ;;  %v1302_v16 = vor.u32 1.1754944e-38, %v1301_v5  ;;  %vm1300_vm12 = vcmp.eq.f32.partialorder %v1299_v58, 8.507059e+37 }
 0x4ba   :  { %v1472_v62 = vsub.f32 1.0, %v1274_v17  ;;  %v1278_v0 = vmul.f32 %v1959_v44, %v1277_v14 }
 0x4bb   :  { %v1203_v38 = vmul.f32 %v1166_v55, %v1166_v55 }
 0x4bc   :  { %1843 = vmatmul.msk.f32.gmra.mxu0 %vm3551_vm4, %v1472_v62  ;;  %v1279_v59 = vadd.f32 %v1959_v44, %v1278_v0 }
 0x4bd   :  { %v1961_v45 = vpop.eup %1960  ;;  %v1219_v39 = vadd.f32 1.0, %v1203_v38 }
 0x4be   :  { %v1291_v20 = vmul.f32 %v1961_v45, %v1218_v19  ;;  %v1283_v41 = vsel %vm1282_vm15, %v1959_v44, %v1279_v59  ;;  %vm1296_vm3 = vweird.f32 %v1961_v45 }
 0x4bf   :  { %1962 = vrcp.f32 %v1219_v39  ;;  %v1288_v34 = vsel %vm1285_vm9, %v1287_v40, %v1283_v41  ;;  %vm1297_vm6 = vmor %vm1295_vm0, %vm1296_vm3  ;;  %v1316_v52 = vand.u32 2147483648, %v1219_v39  ;;  %v1314_v9 = vand.u32 2147483647, %v1219_v39 }
 0x4c0   :  { %v1292_v13 = vsub.f32 1.0, %v1291_v20  ;;  %v1168_v12 = vpop.f32.mrf.mxu3  ;;  %v1289_v1 = vmul.f32 2.0, %v1288_v34  ;;  %vm1310_vm5 = vweird.f32 %v1219_v39  ;;  %vm3555_vm3 = vmmov %vm3553_vm1 }
 0x4c1   :  { %v1169_v11 = vadd.f32 %v3262_v54, %v1168_v12  ;;  %v1317_v15 = vor.u32 1.1754944e-38, %v1316_v52  ;;  %vm1315_vm8 = vcmp.eq.f32.partialorder %v1314_v9, 8.507059e+37 }
 0x4c2   :  { %v1473_v51 = vsub.f32 1.0, %v1289_v1  ;;  %v1293_v21 = vmul.f32 %v1961_v45, %v1292_v13 }
 0x4c3   :  { %v1204_v25 = vmul.f32 %v1169_v11, %v1169_v11 }
 0x4c4   :  { %1844 = vmatmul.msk.f32.gmra.mxu0 %vm3552_vm13, %v1473_v51  ;;  %v1294_v61 = vadd.f32 %v1961_v45, %v1293_v21 }
 0x4c5   :  { %v1963_v60 = vpop.eup %1962  ;;  %v1220_v6 = vadd.f32 1.0, %v1204_v25 }
 0x4c6   :  { %v1306_v7 = vmul.f32 %v1963_v60, %v1219_v39  ;;  %v1298_v46 = vsel %vm1297_vm6, %v1961_v45, %v1294_v61  ;;  %vm1311_vm10 = vweird.f32 %v1963_v60 }
 0x4c7   :  { %1964 = vrcp.f32 %v1220_v6  ;;  %v1303_v63 = vsel %vm1300_vm12, %v1302_v16, %v1298_v46  ;;  %vm1312_vm7 = vmor %vm1310_vm5, %vm1311_vm10  ;;  %v1331_v43 = vand.u32 2147483648, %v1220_v6  ;;  %v1329_v26 = vand.u32 2147483647, %v1220_v6 }
 0x4c8   :  { %v1307_v3 = vsub.f32 1.0, %v1306_v7  ;;  %v1171_v8 = vpop.f32.mrf.mxu3  ;;  %v1304_v32 = vmul.f32 2.0, %v1303_v63  ;;  %vm1325_vm4 = vweird.f32 %v1220_v6  ;;  %vm3556_vm10 = vmmov %vm3553_vm1 }
 0x4c9   :  { %v1172_v47 = vadd.f32 %v3262_v54, %v1171_v8  ;;  %v1332_v48 = vor.u32 1.1754944e-38, %v1331_v43  ;;  %vm1330_vm15 = vcmp.eq.f32.partialorder %v1329_v26, 8.507059e+37 }
 0x4ca   :  { %v1474_v49 = vsub.f32 1.0, %v1304_v32  ;;  %v1308_v27 = vmul.f32 %v1963_v60, %v1307_v3 }
 0x4cb   :  { %v1205_v56 = vmul.f32 %v1172_v47, %v1172_v47 }
 0x4cc   :  { %1845 = vmatmul.msk.f32.gmra.mxu0 %vm3553_vm1, %v1474_v49  ;;  %v1309_v4 = vadd.f32 %v1963_v60, %v1308_v27 }
 0x4cd   :  { %v1965_v23 = vpop.eup %1964  ;;  %v1221_v50 = vadd.f32 1.0, %v1205_v56 }
 0x4ce   :  { %v1321_v35 = vmul.f32 %v1965_v23, %v1220_v6  ;;  %v1313_v57 = vsel %vm1312_vm7, %v1963_v60, %v1309_v4  ;;  %vm1326_vm14 = vweird.f32 %v1965_v23 }
 0x4cf   :  { %1966 = vrcp.f32 %v1221_v50  ;;  %v1318_v31 = vsel %vm1315_vm8, %v1317_v15, %v1313_v57  ;;  %vm1327_vm11 = vmor %vm1325_vm4, %vm1326_vm14  ;;  %v1346_v62 = vand.u32 2147483648, %v1221_v50  ;;  %v1344_v38 = vand.u32 2147483647, %v1221_v50 }
 0x4d0   :  { %v1322_v37 = vsub.f32 1.0, %v1321_v35  ;;  %v1174_v28 = vpop.f32.mrf.mxu3  ;;  %v1319_v30 = vmul.f32 2.0, %v1318_v31  ;;  %vm1340_vm13 = vweird.f32 %v1221_v50  ;;  %vm3557_vm14 = vmmov %vm3554_vm2 }
 0x4d1   :  { %v1175_v36 = vadd.f32 %v3262_v54, %v1174_v28  ;;  %v1347_v20 = vor.u32 1.1754944e-38, %v1346_v62  ;;  %vm1345_vm6 = vcmp.eq.f32.partialorder %v1344_v38, 8.507059e+37 }
 0x4d2   :  { %v1475_v10 = vsub.f32 1.0, %v1319_v30  ;;  %v1323_v18 = vmul.f32 %v1965_v23, %v1322_v37 }
 0x4d3   :  { %v1206_v2 = vmul.f32 %v1175_v36, %v1175_v36 }
 0x4d4   :  { %1846 = vmatmul.msk.f32.gmra.mxu0 %vm3554_vm2, %v1475_v10  ;;  %v1324_v44 = vadd.f32 %v1965_v23, %v1323_v18 }
 0x4d5   :  { %v1967_v19 = vpop.eup %1966  ;;  %v1222_v29 = vadd.f32 1.0, %v1206_v2 }
 0x4d6   :  { %v1336_v33 = vmul.f32 %v1967_v19, %v1221_v50  ;;  %v1328_v42 = vsel %vm1327_vm11, %v1965_v23, %v1324_v44  ;;  %vm1341_vm9 = vweird.f32 %v1967_v19 }
 0x4d7   :  { %1968 = vrcp.f32 %v1222_v29  ;;  %v1333_v14 = vsel %vm1330_vm15, %v1332_v48, %v1328_v42  ;;  %vm1342_vm0 = vmor %vm1340_vm13, %vm1341_vm9  ;;  %v1361_v51 = vand.u32 2147483648, %v1222_v29  ;;  %v1359_v25 = vand.u32 2147483647, %v1222_v29 }
 0x4d8   :  { %v1337_v53 = vsub.f32 1.0, %v1336_v33  ;;  %v1177_v17 = vpop.f32.mrf.mxu3  ;;  %v1334_v55 = vmul.f32 2.0, %v1333_v14  ;;  %vm1355_vm1 = vweird.f32 %v1222_v29  ;;  %vm3558_vm9 = vmmov %vm3555_vm3 }
 0x4d9   :  { %v1178_v22 = vadd.f32 %v3262_v54, %v1177_v17  ;;  %v1362_v7 = vor.u32 1.1754944e-38, %v1361_v51  ;;  %vm1360_vm7 = vcmp.eq.f32.partialorder %v1359_v25, 8.507059e+37 }
 0x4da   :  { %v1476_v0 = vsub.f32 1.0, %v1334_v55  ;;  %v1338_v24 = vmul.f32 %v1967_v19, %v1337_v53 }
 0x4db   :  { %v1207_v59 = vmul.f32 %v1178_v22, %v1178_v22 }
 0x4dc   :  { %1847 = vmatmul.msk.f32.gmra.mxu0 %vm3555_vm3, %v1476_v0  ;;  %v1339_v45 = vadd.f32 %v1967_v19, %v1338_v24 }
 0x4dd   :  { %v1969_v39 = vpop.eup %1968  ;;  %v1223_v40 = vadd.f32 1.0, %v1207_v59 }
 0x4de   :  { %v1351_v41 = vmul.f32 %v1969_v39, %v1222_v29  ;;  %v1343_v34 = vsel %vm1342_vm0, %v1967_v19, %v1339_v45  ;;  %vm1356_vm12 = vweird.f32 %v1969_v39 }
 0x4df   :  { %1970 = vrcp.f32 %v1223_v40  ;;  %v1348_v13 = vsel %vm1345_vm6, %v1347_v20, %v1343_v34  ;;  %vm1357_vm5 = vmor %vm1355_vm1, %vm1356_vm12  ;;  %v1376_v49 = vand.u32 2147483648, %v1223_v40  ;;  %v1374_v56 = vand.u32 2147483647, %v1223_v40 }
 0x4e0   :  { %v1352_v12 = vsub.f32 1.0, %v1351_v41  ;;  %v1180_v1 = vpop.f32.mrf.mxu3  ;;  %v1349_v11 = vmul.f32 2.0, %v1348_v13  ;;  %vm1370_vm2 = vweird.f32 %v1223_v40  ;;  %vm3559_vm12 = vmmov %vm3558_vm9 }
 0x4e1   :  { %v1181_v5 = vadd.f32 %v3262_v54, %v1180_v1  ;;  %v1377_v35 = vor.u32 1.1754944e-38, %v1376_v49  ;;  %vm1375_vm11 = vcmp.eq.f32.partialorder %v1374_v56, 8.507059e+37 }
 0x4e2   :  { %v1477_v21 = vsub.f32 1.0, %v1349_v11  ;;  %v1353_v58 = vmul.f32 %v1969_v39, %v1352_v12 }
 0x4e3   :  { %v1208_v61 = vmul.f32 %v1181_v5, %v1181_v5 }
 0x4e4   :  { %1848 = vmatmul.msk.f32.gmra.mxu0 %vm3556_vm10, %v1477_v21  ;;  %v1354_v60 = vadd.f32 %v1969_v39, %v1353_v58 }
 0x4e5   :  { %v1971_v6 = vpop.eup %1970  ;;  %v1224_v16 = vadd.f32 1.0, %v1208_v61 }
 0x4e6   :  { %v1366_v46 = vmul.f32 %v1971_v6, %v1223_v40  ;;  %v1358_v63 = vsel %vm1357_vm5, %v1969_v39, %v1354_v60  ;;  %vm1371_vm8 = vweird.f32 %v1971_v6 }
 0x4e7   :  { %1972 = vrcp.f32 %v1224_v16  ;;  %v1363_v3 = vsel %vm1360_vm7, %v1362_v7, %v1358_v63  ;;  %vm1372_vm4 = vmor %vm1370_vm2, %vm1371_vm8  ;;  %v1391_v10 = vand.u32 2147483648, %v1224_v16  ;;  %v1389_v2 = vand.u32 2147483647, %v1224_v16 }
 0x4e8   :  { %v1367_v8 = vsub.f32 1.0, %v1366_v46  ;;  %v1183_v32 = vpop.f32.mrf.mxu3  ;;  %v1364_v47 = vmul.f32 2.0, %v1363_v3  ;;  %vm1385_vm3 = vweird.f32 %v1224_v16  ;;  %vm3560_vm8 = vmmov %vm3558_vm9 }
 0x4e9   :  { %v1184_v52 = vadd.f32 %v3262_v54, %v1183_v32  ;;  %v1392_v33 = vor.u32 1.1754944e-38, %v1391_v10  ;;  %vm1390_vm0 = vcmp.eq.f32.partialorder %v1389_v2, 8.507059e+37 }
 0x4ea   :  { %v1478_v27 = vsub.f32 1.0, %v1364_v47  ;;  %v1368_v9 = vmul.f32 %v1971_v6, %v1367_v8 }
 0x4eb   :  { %v1209_v4 = vmul.f32 %v1184_v52, %v1184_v52 }
 0x4ec   :  { %1849 = vmatmul.msk.f32.gmra.mxu0 %vm3557_vm14, %v1478_v27  ;;  %v1369_v23 = vadd.f32 %v1971_v6, %v1368_v9 }
 0x4ed   :  { %v1973_v50 = vpop.eup %1972  ;;  %v1225_v15 = vadd.f32 1.0, %v1209_v4 }
 0x4ee   :  { %v1381_v57 = vmul.f32 %v1973_v50, %v1224_v16  ;;  %v1373_v31 = vsel %vm1372_vm4, %v1971_v6, %v1369_v23  ;;  %vm1386_vm15 = vweird.f32 %v1973_v50 }
 0x4ef   :  { %1974 = vrcp.f32 %v1225_v15  ;;  %v1378_v37 = vsel %vm1375_vm11, %v1377_v35, %v1373_v31  ;;  %vm1387_vm13 = vmor %vm1385_vm3, %vm1386_vm15  ;;  %v1406_v0 = vand.u32 2147483648, %v1225_v15  ;;  %v1404_v59 = vand.u32 2147483647, %v1225_v15 }
 0x4f0   :  { %v1382_v28 = vsub.f32 1.0, %v1381_v57  ;;  %v1186_v30 = vpop.f32.mrf.mxu3  ;;  %v1379_v36 = vmul.f32 2.0, %v1378_v37  ;;  %vm1400_vm10 = vweird.f32 %v1225_v15  ;;  %vm3561_vm15 = vmmov %vm3560_vm8 }
 0x4f1   :  { %v1187_v43 = vadd.f32 %v3262_v54, %v1186_v30  ;;  %v1407_v41 = vor.u32 1.1754944e-38, %v1406_v0  ;;  %vm1405_vm5 = vcmp.eq.f32.partialorder %v1404_v59, 8.507059e+37 }
 0x4f2   :  { %v1479_v18 = vsub.f32 1.0, %v1379_v36  ;;  %v1383_v26 = vmul.f32 %v1973_v50, %v1382_v28 }
 0x4f3   :  { %v1210_v44 = vmul.f32 %v1187_v43, %v1187_v43 }
 0x4f4   :  { %1850 = vmatmul.msk.f32.gmra.mxu0 %vm3558_vm9, %v1479_v18  ;;  %v1384_v19 = vadd.f32 %v1973_v50, %v1383_v26 }
 0x4f5   :  { %v1975_v29 = vpop.eup %1974  ;;  %v1226_v48 = vadd.f32 1.0, %v1210_v44 }
 0x4f6   :  { %v1396_v42 = vmul.f32 %v1975_v29, %v1225_v15  ;;  %v1388_v14 = vsel %vm1387_vm13, %v1973_v50, %v1384_v19  ;;  %vm1401_vm6 = vweird.f32 %v1975_v29 }
 0x4f7   :  { %1976 = vrcp.f32 %v1226_v48  ;;  %v1393_v53 = vsel %vm1390_vm0, %v1392_v33, %v1388_v14  ;;  %vm1402_vm1 = vmor %vm1400_vm10, %vm1401_vm6  ;;  %v1421_v21 = vand.u32 2147483648, %v1226_v48  ;;  %v1419_v61 = vand.u32 2147483647, %v1226_v48 }
 0x4f8   :  { %v1397_v17 = vsub.f32 1.0, %v1396_v42  ;;  %v1189_v55 = vpop.f32.mrf.mxu3  ;;  %v1394_v22 = vmul.f32 2.0, %v1393_v53  ;;  %vm1415_vm14 = vweird.f32 %v1226_v48  ;;  %vm3562_vm6 = vmmov %vm3560_vm8 }
 0x4f9   :  { %v1190_v62 = vadd.f32 %v3262_v54, %v1189_v55  ;;  %v1422_v46 = vor.u32 1.1754944e-38, %v1421_v21  ;;  %vm1420_vm4 = vcmp.eq.f32.partialorder %v1419_v61, 8.507059e+37 }
 0x4fa   :  { %v1480_v24 = vsub.f32 1.0, %v1394_v22  ;;  %v1398_v38 = vmul.f32 %v1975_v29, %v1397_v17 }
 0x4fb   :  { %v1211_v45 = vmul.f32 %v1190_v62, %v1190_v62 }
 0x4fc   :  { %1851 = vmatmul.msk.f32.gmra.mxu0 %vm3559_vm12, %v1480_v24  ;;  %v1399_v39 = vadd.f32 %v1975_v29, %v1398_v38 }
 0x4fd   :  { %v1977_v40 = vpop.eup %1976  ;;  %v1227_v20 = vadd.f32 1.0, %v1211_v45 }
 0x4fe   :  { %v1411_v34 = vmul.f32 %v1977_v40, %v1226_v48  ;;  %v1403_v13 = vsel %vm1402_vm1, %v1975_v29, %v1399_v39  ;;  %vm1416_vm7 = vweird.f32 %v1977_v40 }
 0x4ff   :  { %1978 = vrcp.f32 %v1227_v20  ;;  %v1408_v12 = vsel %vm1405_vm5, %v1407_v41, %v1403_v13  ;;  %vm1417_vm2 = vmor %vm1415_vm14, %vm1416_vm7  ;;  %v1436_v27 = vand.u32 2147483648, %v1227_v20  ;;  %v1434_v4 = vand.u32 2147483647, %v1227_v20 }
 0x500   :  { %v1412_v1 = vsub.f32 1.0, %v1411_v34  ;;  %v1192_v11 = vpop.f32.mrf.mxu3  ;;  %v1409_v5 = vmul.f32 2.0, %v1408_v12  ;;  %vm1430_vm9 = vweird.f32 %v1227_v20  ;;  %vm3563_vm7 = vmmov %vm3562_vm6  ;;  %v2071_v13 = vmov 0  }
 0x501   :  { %v1193_v51 = vadd.f32 %v3262_v54, %v1192_v11  ;;  %v1437_v57 = vor.u32 1.1754944e-38, %v1436_v27  ;;  %vm1435_vm13 = vcmp.eq.f32.partialorder %v1434_v4, 8.507059e+37  ;;  %1881 = vset.pattern.permute.xlu2 %v2071_v13  ;;  %1882 = vset.pattern.permute.xlu1 %v2071_v13  ;;  %v3566_v4 = vld [vmem:[#allocation34_spill] sm:$0xff] }
 0x502   :  { %v1481_v58 = vsub.f32 1.0, %v1409_v5  ;;  %v1413_v25 = vmul.f32 %v1977_v40, %v1412_v1  ;;  %1883 = vset.pattern.permute.xlu0 %v2071_v13  ;;  %v3573_v13 = vld [vmem:[#allocation26_spill] sm:$0xff] }
 0x503   :  { %v1212_v60 = vmul.f32 %v1193_v51, %v1193_v51 }
 0x504   :  { %1852 = vmatmul.msk.f32.gmra.mxu0 %vm3560_vm8, %v1481_v58  ;;  %v1414_v6 = vadd.f32 %v1977_v40, %v1413_v25  ;;  %v81_v58 = vld [vmem:[#allocation2 + $0x74] sm:$0x1] }
 0x505   :  { %v1979_v16 = vpop.eup %1978  ;;  %v1228_v7 = vadd.f32 1.0, %v1212_v60  ;;  %1874 = vpush %v81_v58 }
 0x506   :  { %v1426_v63 = vmul.f32 %v1979_v16, %v1227_v20  ;;  %v1418_v3 = vsel %vm1417_vm2, %v1977_v40, %v1414_v6  ;;  %vm1431_vm11 = vweird.f32 %v1979_v16 }
 0x507   :  { %1980 = vrcp.f32 %v1228_v7  ;;  %v1423_v8 = vsel %vm1420_vm4, %v1422_v46, %v1418_v3  ;;  %vm1432_vm3 = vmor %vm1430_vm9, %vm1431_vm11  ;;  %v1451_v36 = vand.u32 2147483648, %v1228_v7  ;;  %v1449_v18 = vand.u32 2147483647, %v1228_v7 }
 0x508   :  { %v1427_v32 = vsub.f32 1.0, %v1426_v63  ;;  %v1195_v47 = vpop.f32.mrf.mxu3  ;;  %v1424_v52 = vmul.f32 2.0, %v1423_v8  ;;  %vm1445_vm12 = vweird.f32 %v1228_v7  ;;  %vm3564_vm4 = vmmov %vm3562_vm6  ;;  %vm3581_vm11 = vcmask 64512  }
 0x509   :  { %v1196_v49 = vadd.f32 %v3262_v54, %v1195_v47  ;;  %v1452_v44 = vor.u32 1.1754944e-38, %v1451_v36  ;;  %vm1450_vm1 = vcmp.eq.f32.partialorder %v1449_v18, 8.507059e+37  ;;  %v3568_v36 = vld [vmem:[#allocation31_spill] sm:$0xff]  ;;  %v2004_v18 = vld [vmem:[%s3383_s1 + $0x58] sm:$0xff] }
 0x50a   :  { %v1428_v9 = vmul.f32 %v1979_v16, %v1427_v32  ;;  %v1482_v56 = vsub.f32 1.0, %v1424_v52  ;;  %v2000_v32 = vld [vmem:[%s3383_s1 + $0x78] sm:$0xff] }
 0x50b   :  { %v1213_v23 = vmul.f32 %v1196_v49, %v1196_v49  ;;  %v2001_v49 = vld [vmem:[%s3383_s1 + $0x70] sm:$0xff] }
 0x50c   :  { %1853 = vmatmul.msk.f32.gmra.mxu0 %vm3561_vm15, %v1482_v56  ;;  %v1429_v50 = vadd.f32 %v1979_v16, %v1428_v9  ;;  %v3565_v9 = vld [vmem:[#allocation33_spill] sm:$0xff] }
 0x50d   :  { %v1981_v15 = vpop.eup %1980  ;;  %v1229_v35 = vadd.f32 1.0, %v1213_v23 }
 0x50e   :  { %v1441_v31 = vmul.f32 %v1981_v15, %v1228_v7  ;;  %v1433_v37 = vsel %vm1432_vm3, %v1979_v16, %v1429_v50  ;;  %vm1446_vm0 = vweird.f32 %v1981_v15 }
 0x50f   :  { %1982 = vrcp.f32 %v1229_v35  ;;  %v1438_v28 = vsel %vm1435_vm13, %v1437_v57, %v1433_v37  ;;  %vm1447_vm10 = vmor %vm1445_vm12, %vm1446_vm0  ;;  %v1466_v14 = vand.u32 2147483648, %v1229_v35  ;;  %v1464_v55 = vand.u32 2147483647, %v1229_v35  ;;  %v3567_v57 = vld [vmem:[#allocation32_spill] sm:$0xff] }
 0x510   :  { %v1442_v54 = vsub.f32 1.0, %v1441_v31  ;;  %v1439_v30 = vmul.f32 2.0, %v1438_v28  ;;  %vm1460_vm8 = vweird.f32 %v1229_v35 }
 0x511   :  { %v1467_v62 = vor.u32 1.1754944e-38, %v1466_v14  ;;  %vm1465_vm2 = vcmp.eq.f32.partialorder %v1464_v55, 8.507059e+37  ;;  %v3571_v55 = vld [vmem:[#allocation28_spill] sm:$0xff] }
 0x512   :  { %v1443_v43 = vmul.f32 %v1981_v15, %v1442_v54  ;;  %v1483_v10 = vsub.f32 1.0, %v1439_v30  ;;  %v2003_v54 = vld [vmem:[%s3383_s1 + $0x60] sm:$0xff] }
 0x514   :  { %1854 = vmatmul.msk.f32.gmra.mxu0 %vm3562_vm6, %v1483_v10  ;;  %v1444_v26 = vadd.f32 %v1981_v15, %v1443_v43 }
 0x515   :  { %v1983_v2 = vpop.eup %1982 }
 0x516   :  { %v1456_v19 = vmul.f32 %v1983_v2, %v1229_v35  ;;  %v1448_v29 = vsel %vm1447_vm10, %v1981_v15, %v1444_v26  ;;  %vm1461_vm5 = vweird.f32 %v1983_v2  ;;  %v2002_v15 = vld [vmem:[%s3383_s1 + $0x68] sm:$0xff] }
 0x517   :  { %v1453_v48 = vsel %vm1450_vm1, %v1452_v44, %v1448_v29  ;;  %vm1462_vm14 = vmor %vm1460_vm8, %vm1461_vm5 }
 0x518   :  { %v1457_v33 = vsub.f32 1.0, %v1456_v19  ;;  %v1454_v42 = vmul.f32 2.0, %v1453_v48  ;;  %v2005_v48 = vld [vmem:[%s3383_s1 + $0x50] sm:$0xff] }
 0x51a   :  { %v1458_v53 = vmul.f32 %v1983_v2, %v1457_v33  ;;  %v1484_v17 = vsub.f32 1.0, %v1454_v42  ;;  %v3570_v42 = vld [vmem:[#allocation30_spill] sm:$0xff] }
 0x51c   :  { %1855 = vmatmul.msk.f32.gmra.mxu0 %vm3563_vm7, %v1484_v17  ;;  %v1459_v22 = vadd.f32 %v1983_v2, %v1458_v53 }
 0x51e   :  { %v1463_v0 = vsel %vm1462_vm14, %v1983_v2, %v1459_v22  ;;  %v3569_v2 = vld [vmem:[#allocation29_spill] sm:$0xff] }
 0x51f   :  { %v1468_v24 = vsel %vm1465_vm2, %v1467_v62, %v1463_v0 }
 0x520   :  { %v1469_v38 = vmul.f32 2.0, %v1468_v24  ;;  %v2006_v24 = vld [vmem:[%s3383_s1 + $0x40] sm:$0xff] }
 0x522   :  { %v1485_v59 = vsub.f32 1.0, %v1469_v38 }
 0x524   :  { %1856 = vmatmul.msk.f32.gmra.mxu0 %vm3564_vm4, %v1485_v59  ;;  %v3572_v59 = vld [vmem:[#allocation27_spill] sm:$0xff] }
 0x529   :  { %v1551_v45 = vpop.f32.mrf.mxu0 }
 0x531   :  { %v1554_v39 = vpop.f32.mrf.mxu0 }
 0x536   :  { %s1875_s0 = spop %1874 }
 0x537   :  { %v3296_v8 = vstv %s1875_s0 }
 0x538   :  { %v1714_v47 = vmul.f32 %v2000_v32, %v3296_v8  ;;  %v1713_v27 = vmul.f32 %v2001_v49, %v3296_v8  ;;  %v1712_v35 = vmul.f32 %v2002_v15, %v3296_v8  ;;  %v1711_v30 = vmul.f32 %v2003_v54, %v3296_v8 }
 0x539   :  { %v1557_v40 = vpop.f32.mrf.mxu0  ;;  %v1710_v26 = vmul.f32 %v2004_v18, %v3296_v8  ;;  %v1709_v33 = vmul.f32 %v2005_v48, %v3296_v8  ;;  %v1707_v38 = vmul.f32 %v2006_v24, %v3296_v8 }
 0x541   :  { %v1560_v20 = vpop.f32.mrf.mxu0 }
 0x549   :  { %v1563_v41 = vpop.f32.mrf.mxu0 }
 0x551   :  { %v1566_v34 = vpop.f32.mrf.mxu0 }
 0x559   :  { %v1569_v12 = vpop.f32.mrf.mxu0 }
 0x561   :  { %v1572_v1 = vpop.f32.mrf.mxu0 }
 0x569   :  { %v1575_v11 = vpop.f32.mrf.mxu0 }
 0x571   :  { %v1578_v5 = vpop.f32.mrf.mxu0 }
 0x579   :  { %v1581_v51 = vpop.f32.mrf.mxu0 }
 0x57a   :  { %1651 = vperm.xlu2 %1881, %v1581_v51   ;;  %v3574_v51 = vld [vmem:[#allocation25_spill] sm:$0xff] }
 0x581   :  { %v1584_v21 = vpop.f32.mrf.mxu0 }
 0x582   :  { %1656 = vperm.xlu2 %1881, %v1584_v21  }
 0x589   :  { %v1587_v25 = vpop.f32.mrf.mxu0 }
 0x58a   :  { %1636 = vperm.xlu2 %1881, %v1572_v1   ;;  %1661 = vperm.xlu1 %1882, %v1587_v25   ;;  %v2009_v25 = vld [vmem:[%s3383_s1 + $0x28] sm:$0xff] }
 0x591   :  { %v1590_v61 = vpop.f32.mrf.mxu0 }
 0x592   :  { %1621 = vperm.xlu2 %1881, %v1563_v41   ;;  %1666 = vperm.xlu1 %1882, %v1590_v61   ;;  %v2008_v41 = vld [vmem:[%s3383_s1 + $0x38] sm:$0xff]  ;;  %v1704_v61 = vmul.f32 %v2009_v25, %v3296_v8 }
 0x599   :  { %v1593_v60 = vpop.f32.mrf.mxu0 }
 0x59a   :  { %1606 = vperm.xlu2 %1881, %v1554_v39   ;;  %1641 = vperm.xlu1 %1882, %v1575_v11   ;;  %v2007_v39 = vld [vmem:[%s3383_s1 + $0x48] sm:$0xff] }
 0x59b   :  { %1671 = vperm.xlu0 %1883, %v1593_v60   ;;  %v3575_v60 = vld [vmem:[#allocation24_spill] sm:$0xff] }
 0x5a1   :  { %v1596_v6 = vpop.f32.mrf.mxu0 }
 0x5a2   :  { %1626 = vperm.xlu1 %1882, %v1566_v34   ;;  %v1706_v34 = vmul.f32 %v2008_v41, %v3296_v8 }
 0x5a3   :  { %1676 = vperm.xlu0 %1883, %v1596_v6  }
 0x5aa   :  { %1611 = vperm.xlu1 %1882, %v1557_v40   ;;  %v1708_v40 = vmul.f32 %v2007_v39, %v3296_v8 }
 0x5ab   :  { %1646 = vperm.xlu0 %1883, %v1578_v5  }
 0x5b3   :  { %1631 = vperm.xlu0 %1883, %v1569_v12  }
 0x5bb   :  { %1616 = vperm.xlu0 %1883, %v1560_v20  }
 0x5c3   :  { %1601 = vperm.xlu0 %1883, %v1551_v45  }
 0x5d4   :  { %v1652_v7 = vpop.permute.xlu2 %1651 }
 0x5d5   :  { %v1689_v14 = vmul.f32 %v1652_v7, %v3570_v42  ;;  %v76_v42 = vld [vmem:[#allocation2 + $0x68] sm:$0xff] }
 0x5d7   :  { %v1725_v0 = vadd.f32 %v1709_v33, %v1689_v14  ;;  %v82_v33 = vld [vmem:[#allocation2 + $0x78] sm:$0xff] }
 0x5dc   :  { %v1657_v3 = vpop.permute.xlu2 %1656 }
 0x5dd   :  { %v1690_v44 = vmul.f32 %v1657_v3, %v3569_v2  ;;  %v3576_v3 = vld [vmem:[#allocation23_spill] sm:$0xff] }
 0x5de   :  { %v2015_v2 = vld [vmem:[%s3383_s1] sm:$0xff] }
 0x5df   :  { %v1726_v17 = vadd.f32 %v1710_v26, %v1690_v44  ;;  %v1699_v44 = vmul.f32 %v2015_v2, %v3296_v8 }
 0x5e4   :  { %v1637_v28 = vpop.permute.xlu2 %1636 }
 0x5e5   :  { %v1686_v12 = vmul.f32 %v1637_v28, %v3573_v13  ;;  %v3579_v28 = vld [vmem:[#allocation20_spill] sm:$0xff] }
 0x5e7   :  { %v1722_v58 = vadd.f32 %v1706_v34, %v1686_v12 }
 0x5ec   :  { %v1622_v20 = vpop.permute.xlu2 %1621 }
 0x5ed   :  { %v1683_v32 = vmul.f32 %v1622_v20, %v3576_v3 }
 0x5fc   :  { %v1662_v16 = vpop.permute.xlu1 %1661 }
 0x5fd   :  { %v1691_v43 = vmul.f32 %v1662_v16, %v3568_v36  ;;  %v2010_v16 = vld [vmem:[%s3383_s1 + $0x30] sm:$0xff] }
 0x5fe   :  { %v1705_v7 = vmul.f32 %v2010_v16, %v3296_v8 }
 0x5ff   :  { %v1727_v53 = vadd.f32 %v1711_v30, %v1691_v43  ;;  %v2014_v30 = vld [vmem:[%s3383_s1 + $0x10] sm:$0xff] }
 0x600   :  { %v1701_v36 = vmul.f32 %v2014_v30, %v3296_v8 }
 0x604   :  { %v1667_v46 = vpop.permute.xlu1 %1666 }
 0x605   :  { %v1692_v31 = vmul.f32 %v1667_v46, %v3567_v57  ;;  %v2011_v46 = vld [vmem:[%s3383_s1 + $0x20] sm:$0xff] }
 0x607   :  { %v1728_v19 = vadd.f32 %v1712_v35, %v1692_v31  ;;  %v3578_v35 = vld [vmem:[#allocation22_spill] sm:$0xff]  ;;  %v2013_v31 = vld [vmem:[%s3383_s1 + $0x8] sm:$0xff] }
 0x60c   :  { %v1642_v50 = vpop.permute.xlu1 %1641 }
 0x60d   :  { %v1672_v63 = vpop.permute.xlu0 %1671  ;;  %v1687_v45 = vmul.f32 %v1642_v50, %v3572_v59  ;;  %v2012_v50 = vld [vmem:[%s3383_s1 + $0x18] sm:$0xff]  ;;  %s1783_s1 = sshll.u32 %s3385_s3, 4  ;;  %s1784_s1 = int_to_ptr.hbm [resolvable:$true] %s1783_s1 }
 0x60e   :  { %v1693_v56 = vmul.f32 %v1672_v63, %v3565_v9  ;;  %v1703_v63 = vmul.f32 %v2011_v46, %v3296_v8  ;;  %v1702_v15 = vmul.f32 %v2012_v50, %v3296_v8 }
 0x60f   :  { %v1723_v5 = vadd.f32 %v1707_v38, %v1687_v45 }
 0x610   :  { %v1729_v10 = vadd.f32 %v1713_v27, %v1693_v56  ;;  %v1607_v27 = vpop.permute.xlu2 %1606  ;;  %v1719_v56 = vadd.f32 %v1703_v63, %v1683_v32 }
 0x611   :  { %v1680_v54 = vmul.f32 %v1607_v27, %v3579_v28 }
 0x614   :  { %v1627_v62 = vpop.permute.xlu1 %1626 }
 0x615   :  { %v1677_v52 = vpop.permute.xlu0 %1676  ;;  %v1684_v6 = vmul.f32 %v1627_v62, %v3575_v60 }
 0x616   :  { %v1694_v23 = vmul.f32 %v1677_v52, %v3566_v4  ;;  %v3577_v4 = vld [vmem:[#allocation21_spill] sm:$0xff] }
 0x617   :  { %v1720_v49 = vadd.f32 %v1704_v61, %v1684_v6 }
 0x618   :  { %v1730_v37 = vadd.f32 %v1714_v47, %v1694_v23 }
 0x61a   :  { %1731 = vmatpush.msra.mxu2 %v1730_v37  ;;  %v1700_v37 = vmul.f32 %v2013_v31, %v3296_v8 }
 0x61c   :  { %1732 = vmatpush.msra.mxu2 %v1729_v10  ;;  %v1612_v52 = vpop.permute.xlu1 %1611  ;;  %v1716_v18 = vadd.f32 %v1700_v37, %v1680_v54 }
 0x61d   :  { %v1647_v29 = vpop.permute.xlu0 %1646  ;;  %v1681_v23 = vmul.f32 %v1612_v52, %v3577_v4 }
 0x61e   :  { %1733 = vmatpush.msra.mxu2 %v1728_v19  ;;  %v1688_v22 = vmul.f32 %v1647_v29, %v3571_v55  ;;  %v3580_v19 = vld [vmem:[#allocation19_spill] sm:$0xff] }
 0x61f   :  { %v1717_v10 = vadd.f32 %v1701_v36, %v1681_v23 }
 0x620   :  { %1734 = vmatpush.msra.mxu2 %v1727_v53  ;;  %v1724_v1 = vadd.f32 %v1708_v40, %v1688_v22  ;;  %v1887_v53 = vld [vmem:[#allocation2 + $0x73] ss:$0 sm:$0xff] }
 0x622   :  { %1735 = vmatpush.msra.mxu2 %v1726_v17 }
 0x624   :  { %1736 = vmatpush.msra.mxu2 %v1725_v0 }
 0x625   :  { %v1632_v11 = vpop.permute.xlu0 %1631 }
 0x626   :  { %v1685_v21 = vmul.f32 %v1632_v11, %v3574_v51  ;;  %1737 = vmatpush.msra.mxu2 %v1724_v1 }
 0x628   :  { %1738 = vmatpush.msra.mxu2 %v1723_v5  ;;  %v1721_v47 = vadd.f32 %v1705_v7, %v1685_v21 }
 0x62a   :  { %1739 = vmatpush.msra.mxu2 %v1722_v58 }
 0x62c   :  { %1740 = vmatpush.msra.mxu2 %v1721_v47 }
 0x62d   :  { %v1617_v9 = vpop.permute.xlu0 %1616 }
 0x62e   :  { %v1682_v57 = vmul.f32 %v1617_v9, %v3578_v35  ;;  %1741 = vmatpush.msra.mxu2 %v1720_v49 }
 0x630   :  { %v1718_v43 = vadd.f32 %v1702_v15, %v1682_v57  ;;  %1742 = vmatpush.msra.mxu2 %v1719_v56 }
 0x632   :  { %1743 = vmatpush.msra.mxu2 %v1718_v43 }
 0x634   :  { %1744 = vmatpush.msra.mxu2 %v1717_v10 }
 0x635   :  { %v1602_v26 = vpop.permute.xlu0 %1601 }
 0x636   :  { %v1679_v29 = vmul.f32 %v1602_v26, %v3580_v19  ;;  %1745 = vmatpush.msra.mxu2 %v1716_v18 }
 0x638   :  { %v1715_v48 = vadd.f32 %v1699_v44, %v1679_v29 }
 0x63a   :  { %1746 = vmatpush.msra.mxu2 %v1715_v48 }
 0x63b   :  { %1747 = vmatmul.f32.vlgmr.msra.gmra.mxu2 %v82_v33 }
 0x63c   :  { %1770 = vmatpush.msrb.mxu2 %v76_v42 }
 0x6be   :  { %v1748_v14 = vpop.f32.mrf.mxu2 }
 0x6bf   :  { %1857 = vmatmul.msk.f32.vlgmr.msrb.gmra.mxu2 %vm3581_vm11, %v1748_v14 }
 0x742   :  { %v1772_v8 = vpop.f32.mrf.mxu2 }
 0x743   :  { %v1773_v17 = vadd.f32 %v1887_v53, %v1772_v8 }
 0x745   :  { %1775 = vst [vmem:[#allocation5] sm:$0xff] %v1773_v17 }
 0x746   :  { %1786 = dma.vmem_to_hbm [thread:$0]  %s1782_s7, 128, %s1784_s1, [#allocation4]  }
 0x747   :  { %2066 = dma.done.wait [#allocation4], 128  }
 0x748   :  { %2067 = vsyncadd [#allocation4], 4294967168 }
 0x749   :  { %1791 = vsyncpa [#allocation3], 1 }
 0x74a   :  { %1792 = vsyncpa [#allocation4], 1 }

</bundles_post_ra>
